<compile_context>
chip_gen: v6e
topology: v6e:2x2x1
jax: 0.10.0
libtpu: 0.0.40
codegen_flags: <defaults>
</compile_context>

<pallas_src>
import functools

import jax
import jax.numpy as jnp
from jax.experimental import pallas as pl
from jax.experimental.pallas import tpu as pltpu

# `input_dim` is not defined in the reference snippet; choose a small value.
INPUT_DIM = 32
LAYER_DIMS = [INPUT_DIM, 1024, 512, 256, 128, 64, 1]

_K_CHUNK = 256  # column/row chunk for the fused layer1+layer2 K-blocking


def _round_up(x, m):
    return ((x + m - 1) // m) * m


# ----------------------------------------------------------------------------
# Kernel
# ----------------------------------------------------------------------------
def _mlp_kernel(x_ref,
                w1, b1, w2, b2, w3, b3, w4, b4, w5, b5, w6, b6,
                o_ref, *, lane_dense):
    """Fused 6-layer MLP on one batch tile.

    w1..w5: (in, out) bf16 (VMEM-resident), b1..b5: (1, out) f32.
    w6: (1, 64) f32 (VPU reduction), b6: (1, 1) f32.
    """
    x_bf = x_ref[...].astype(jnp.bfloat16)            # (bt, INPUT_DIM)
    bt = x_ref.shape[0]

    # ---- Layers 1 + 2, fused with K-blocking over the 1024-wide hidden ----
    # h1 is produced in 256-column chunks (bias+ReLU applied per chunk) and
    # each chunk is immediately contracted against the matching 256-row slice
    # of W2 into an f32 accumulator; h1 never fully materializes.
    n_hidden1 = w1.shape[1]                            # 1024
    acc = jnp.zeros((bt, w2.shape[1]), jnp.float32)    # (bt, 512)
    for c in range(n_hidden1 // _K_CHUNK):
        sl = slice(c * _K_CHUNK, (c + 1) * _K_CHUNK)
        h1c = jnp.dot(x_bf, w1[:, sl], preferred_element_type=jnp.float32)
        h1c = jnp.maximum(h1c + b1[:, sl], 0.0).astype(jnp.bfloat16)
        acc = acc + jnp.dot(h1c, w2[sl, :], preferred_element_type=jnp.float32)
    h = jnp.maximum(acc + b2[...], 0.0).astype(jnp.bfloat16)   # (bt, 512)

    # ---- Layers 3..5: bf16 MXU operands, f32 accumulation, bf16 between ----
    def dense_relu(h, w_ref, b_ref):
        z = jnp.dot(h, w_ref[...], preferred_element_type=jnp.float32)
        return jnp.maximum(z + b_ref[...], 0.0).astype(jnp.bfloat16)

    h = dense_relu(h, w3, b3)   # (bt, 256)
    h = dense_relu(h, w4, b4)   # (bt, 128)
    h = dense_relu(h, w5, b5)   # (bt, 64)

    # ---- Final Linear(64, 1) + Sigmoid ----
    # A (bt,64)x(64,1) matmul would light up a single MXU output lane, so do a
    # VPU multiply + lane reduction instead.
    z = jnp.sum(h.astype(jnp.float32) * w6[...], axis=-1, keepdims=True) + b6[...]
    y = jax.nn.sigmoid(z)                              # (bt, 1) f32
    if lane_dense:
        # Lane-dense store: (1, bt) block -> unmasked vst instead of bt masked
        # single-lane stores.
        o_ref[...] = y.reshape(1, -1).astype(o_ref.dtype)
    else:
        o_ref[...] = y.astype(o_ref.dtype)


# ----------------------------------------------------------------------------
# pallas_call wrapper
# ----------------------------------------------------------------------------
def _pallas_forward(x, flat_params, bt, lane_dense):
    Bp, D = x.shape
    num_tiles = Bp // bt

    in_specs = [pl.BlockSpec((bt, D), lambda i: (i, 0))]
    for p in flat_params:
        # Resident parameter: same block every grid step.
        in_specs.append(pl.BlockSpec(p.shape, lambda i: (0, 0)))

    if lane_dense:
        out_shape = jax.ShapeDtypeStruct((1, Bp), jnp.float32)
        out_spec = pl.BlockSpec((1, bt), lambda i: (0, i))
    else:
        out_shape = jax.ShapeDtypeStruct((Bp, 1), jnp.float32)
        out_spec = pl.BlockSpec((bt, 1), lambda i: (i, 0))

    flops = 2 * Bp * sum(a * b for a, b in zip(LAYER_DIMS[:-1], LAYER_DIMS[1:]))
    param_bytes = sum(int(p.size) * p.dtype.itemsize for p in flat_params)
    bytes_accessed = int(x.size) * 4 + Bp * 4 + param_bytes

    kernel = functools.partial(_mlp_kernel, lane_dense=lane_dense)
    return pl.pallas_call(
        kernel,
        out_shape=out_shape,
        grid_spec=pltpu.PrefetchScalarGridSpec(
            num_scalar_prefetch=0,
            grid=(num_tiles,),
            in_specs=in_specs,
            out_specs=out_spec,
        ),
        compiler_params=pltpu.CompilerParams(
            dimension_semantics=("parallel",),   # shard batch grid across TCs
            vmem_limit_bytes=32 * 1024 * 1024,   # weights ~1.5 MB bf16; ample
        ),
        cost_estimate=pl.CostEstimate(
            flops=flops,
            transcendentals=Bp,            # one sigmoid per row
            bytes_accessed=bytes_accessed,
        ),
    )(x, *flat_params)


def dnn_forward(x, params, *, batch_tile=512):
    """x: (B, INPUT_DIM) f32. params: output of prepare_params()."""
    B, D = x.shape
    assert D == INPUT_DIM

    # Effective batch tile: multiple of 8 sublanes, no larger than the batch.
    B8 = _round_up(B, 8)
    bt = min(_round_up(batch_tile, 8), B8)
    if B8 >= 16:
        # Ensure >= 2 grid steps so both TensorCores work on v7x (harmless on
        # single-core chips).
        bt = min(bt, _round_up((B8 + 1) // 2, 8))
    Bp = _round_up(B, bt)
    if Bp != B:
        x = jnp.pad(x, ((0, Bp - B), (0, 0)))

    num_tiles = Bp // bt
    # Lane-dense output is legal when the (1, bt) block's last dim is either a
    # multiple of 128 or the full array extent.
    lane_dense = (num_tiles == 1) or (bt % 128 == 0)

    flat_params = []
    for (w, b) in params:
        flat_params += [w, b]

    out = _pallas_forward(x, flat_params, bt, lane_dense)
    if lane_dense:
        out = out.reshape(-1, 1)
    return out[:B]


# ----------------------------------------------------------------------------
# Parameters
# ----------------------------------------------------------------------------
def init_params(key):
    """PyTorch-style Linear params: W (out,in), b (out,), f32, fan-in uniform."""
    params = []
    for din, dout in zip(LAYER_DIMS[:-1], LAYER_DIMS[1:]):
        key, kw, kb = jax.random.split(key, 3)
        bound = 1.0 / jnp.sqrt(din)
        w = jax.random.uniform(kw, (dout, din), jnp.float32, -bound, bound)
        b = jax.random.uniform(kb, (dout,), jnp.float32, -bound, bound)
        params.append((w, b))
    return params


def prepare_params(torch_style_params):
    """PyTorch layout -> kernel layout.

    Layers 1..5: W.T as (in, out) bf16, b as (1, out) f32.
    Layer  6   : W kept as (1, 64) f32 (VPU reduction), b as (1, 1) f32.
    """
    prepared = []
    n = len(torch_style_params)
    for i, (w, b) in enumerate(torch_style_params):
        if i < n - 1:
            prepared.append((jnp.asarray(w.T, jnp.bfloat16),
                             b.reshape(1, -1).astype(jnp.float32)))
        else:
            prepared.append((w.astype(jnp.float32),
                             b.reshape(1, 1).astype(jnp.float32)))
    return prepared


# ----------------------------------------------------------------------------
# References
# ----------------------------------------------------------------------------
def reference_forward(x, torch_style_params):
    """Pure-JAX reference mirroring the kernel's numerics (bf16 matmul operands
    and bf16 inter-layer activations, f32 accumulation / bias / sigmoid)."""
    h = x.astype(jnp.bfloat16)
    n = len(torch_style_params)
    for i, (w, b) in enumerate(torch_style_params):
        if i < n - 1:
            z = jnp.dot(h, w.T.astype(jnp.bfloat16),
                        preferred_element_type=jnp.float32) + b[None, :]
            h = jnp.maximum(z, 0.0).astype(jnp.bfloat16)
        else:
            z = jnp.sum(h.astype(jnp.float32) * w.astype(jnp.float32),
                        axis=-1, keepdims=True) + b.reshape(1, 1)
    return jax.nn.sigmoid(z)


def reference_forward_f32(x, torch_style_params):
    """Exact f32 semantics of the PyTorch module (loose sanity check)."""
    h = x
    n = len(torch_style_params)
    for i, (w, b) in enumerate(torch_style_params):
        h = h @ w.T + b[None, :]
        if i < n - 1:
            h = jnp.maximum(h, 0.0)
    return jax.nn.sigmoid(h)


# ----------------------------------------------------------------------------
# Demo / self-test
# ----------------------------------------------------------------------------
if __name__ == "__main__":
    key = jax.random.PRNGKey(0)
    kx, kx2, kx3, kp = jax.random.split(key, 4)

    torch_params = init_params(kp)
    params = prepare_params(torch_params)

    # Small demo batch (bt=8, 2 grid steps, masked-store output path).
    batch = 16
    x = jax.random.normal(kx, (batch, INPUT_DIM), jnp.float32)
    out = jax.block_until_ready(dnn_forward(x, params))
    assert out.shape == (batch, 1)
    ref = reference_forward(x, torch_params)
    err = jnp.max(jnp.abs(out - ref))
    assert jnp.allclose(out, ref, atol=1e-4, rtol=1e-4), f"max abs err {err}"

    # Loose check vs full-f32 PyTorch semantics (difference is only bf16
    # quantization of the matmul operands / inter-layer activations).
    ref32 = reference_forward_f32(x, torch_params)
    err32 = jnp.max(jnp.abs(out - ref32))
    assert jnp.allclose(out, ref32, atol=5e-2), f"f32-ref max abs err {err32}"

    # Ragged batch exercising padding + the non-lane-dense multi-tile path.
    batch2 = 260
    x2 = jax.random.normal(kx2, (batch2, INPUT_DIM), jnp.float32)
    out2 = jax.block_until_ready(dnn_forward(x2, params))
    assert out2.shape == (batch2, 1)
    ref2 = reference_forward(x2, torch_params)
    err2 = jnp.max(jnp.abs(out2 - ref2))
    assert jnp.allclose(out2, ref2, atol=1e-4, rtol=1e-4), f"max abs err {err2}"

    # Larger batch exercising bt=512, 2 grid steps, lane-dense output store.
    batch3 = 1024
    x3 = jax.random.normal(kx3, (batch3, INPUT_DIM), jnp.float32)
    out3 = jax.block_until_ready(dnn_forward(x3, params))
    assert out3.shape == (batch3, 1)
    ref3 = reference_forward(x3, torch_params)
    err3 = jnp.max(jnp.abs(out3 - ref3))
    assert jnp.allclose(out3, ref3, atol=1e-4, rtol=1e-4), f"max abs err {err3}"

    print("KERNEL_OK")
</pallas_src>

<mosaic_0001>
module attributes {stable_mosaic.version = 11 : i64} {
  func.func @_mlp_kernel(%arg0: i32, %arg1: memref<8x32xf32, #tpu.memory_space<vmem>>, %arg2: memref<32x1024xbf16, #tpu.memory_space<vmem>>, %arg3: memref<1x1024xf32, #tpu.memory_space<vmem>>, %arg4: memref<1024x512xbf16, #tpu.memory_space<vmem>>, %arg5: memref<1x512xf32, #tpu.memory_space<vmem>>, %arg6: memref<512x256xbf16, #tpu.memory_space<vmem>>, %arg7: memref<1x256xf32, #tpu.memory_space<vmem>>, %arg8: memref<256x128xbf16, #tpu.memory_space<vmem>>, %arg9: memref<1x128xf32, #tpu.memory_space<vmem>>, %arg10: memref<128x64xbf16, #tpu.memory_space<vmem>>, %arg11: memref<1x64xf32, #tpu.memory_space<vmem>>, %arg12: memref<1x64xf32, #tpu.memory_space<vmem>>, %arg13: memref<1x1xf32, #tpu.memory_space<vmem>>, %arg14: memref<8x1xf32, #tpu.memory_space<vmem>>) attributes {dimension_semantics = [#tpu.dimension_semantics<parallel>], iteration_bounds = array<i64: 2>, scalar_prefetch = 0 : i64, scratch_operands = 0 : i64, tpu.core_type = #tpu.core_type<tc>, window_params = [{transform_indices = @transform_0, window_bounds = array<i64: 8, 32>}, {pipeline_mode = #tpu.pipeline_mode<synchronous>, transform_indices = @transform_1, window_bounds = array<i64: 32, 1024>}, {pipeline_mode = #tpu.pipeline_mode<synchronous>, transform_indices = @transform_2, window_bounds = array<i64: 1, 1024>}, {pipeline_mode = #tpu.pipeline_mode<synchronous>, transform_indices = @transform_3, window_bounds = array<i64: 1024, 512>}, {pipeline_mode = #tpu.pipeline_mode<synchronous>, transform_indices = @transform_4, window_bounds = array<i64: 1, 512>}, {pipeline_mode = #tpu.pipeline_mode<synchronous>, transform_indices = @transform_5, window_bounds = array<i64: 512, 256>}, {pipeline_mode = #tpu.pipeline_mode<synchronous>, transform_indices = @transform_6, window_bounds = array<i64: 1, 256>}, {pipeline_mode = #tpu.pipeline_mode<synchronous>, transform_indices = @transform_7, window_bounds = array<i64: 256, 128>}, {pipeline_mode = #tpu.pipeline_mode<synchronous>, transform_indices = @transform_8, window_bounds = array<i64: 1, 128>}, {pipeline_mode = #tpu.pipeline_mode<synchronous>, transform_indices = @transform_9, window_bounds = array<i64: 128, 64>}, {pipeline_mode = #tpu.pipeline_mode<synchronous>, transform_indices = @transform_10, window_bounds = array<i64: 1, 64>}, {pipeline_mode = #tpu.pipeline_mode<synchronous>, transform_indices = @transform_11, window_bounds = array<i64: 1, 64>}, {pipeline_mode = #tpu.pipeline_mode<synchronous>, transform_indices = @transform_12, window_bounds = array<i64: 1, 1>}, {transform_indices = @transform_13, window_bounds = array<i64: 8, 1>}]} {
    %c0 = arith.constant 0 : index
    %c0_0 = arith.constant 0 : index
    %0 = vector.load %arg1[%c0, %c0_0] : memref<8x32xf32, #tpu.memory_space<vmem>>, vector<8x32xf32>
    %1 = arith.truncf %0 : vector<8x32xf32> to vector<8x32xbf16>
    %cst = arith.constant 0.000000e+00 : f32
    %2 = vector.broadcast %cst : f32 to vector<8x512xf32>
    %c0_1 = arith.constant 0 : index
    %c0_2 = arith.constant 0 : index
    %3 = vector.load %arg2[%c0_1, %c0_2] : memref<32x1024xbf16, #tpu.memory_space<vmem>>, vector<32x256xbf16>
    %cst_3 = arith.constant dense<0.000000e+00> : vector<8x256xf32>
    %4 = tpu.matmul %1, %3, %cst_3 {dimension_numbers = #tpu.dot_dimension_numbers<[1], [0], [0], [1], [0, 0, 1, 1], [], []>} : vector<8x32xbf16>, vector<32x256xbf16>, vector<8x256xf32> -> vector<8x256xf32>
    %c0_4 = arith.constant 0 : index
    %c0_5 = arith.constant 0 : index
    %5 = vector.load %arg3[%c0_4, %c0_5] : memref<1x1024xf32, #tpu.memory_space<vmem>>, vector<1x256xf32>
    %6 = vector.broadcast %5 : vector<1x256xf32> to vector<8x256xf32>
    %7 = arith.addf %4, %6 : vector<8x256xf32>
    %cst_6 = arith.constant 0.000000e+00 : f32
    %8 = vector.broadcast %cst_6 : f32 to vector<8x256xf32>
    %9 = arith.maximumf %7, %8 : vector<8x256xf32>
    %10 = arith.truncf %9 : vector<8x256xf32> to vector<8x256xbf16>
    %c0_7 = arith.constant 0 : index
    %c0_8 = arith.constant 0 : index
    %11 = vector.load %arg4[%c0_7, %c0_8] : memref<1024x512xbf16, #tpu.memory_space<vmem>>, vector<256x512xbf16>
    %cst_9 = arith.constant dense<0.000000e+00> : vector<8x512xf32>
    %12 = tpu.matmul %10, %11, %cst_9 {dimension_numbers = #tpu.dot_dimension_numbers<[1], [0], [0], [1], [0, 0, 1, 1], [], []>} : vector<8x256xbf16>, vector<256x512xbf16>, vector<8x512xf32> -> vector<8x512xf32>
    %13 = arith.addf %2, %12 : vector<8x512xf32>
    %c0_10 = arith.constant 0 : index
    %c256 = arith.constant 256 : index
    %14 = vector.load %arg2[%c0_10, %c256] : memref<32x1024xbf16, #tpu.memory_space<vmem>>, vector<32x256xbf16>
    %cst_11 = arith.constant dense<0.000000e+00> : vector<8x256xf32>
    %15 = tpu.matmul %1, %14, %cst_11 {dimension_numbers = #tpu.dot_dimension_numbers<[1], [0], [0], [1], [0, 0, 1, 1], [], []>} : vector<8x32xbf16>, vector<32x256xbf16>, vector<8x256xf32> -> vector<8x256xf32>
    %c0_12 = arith.constant 0 : index
    %c256_13 = arith.constant 256 : index
    %16 = vector.load %arg3[%c0_12, %c256_13] : memref<1x1024xf32, #tpu.memory_space<vmem>>, vector<1x256xf32>
    %17 = vector.broadcast %16 : vector<1x256xf32> to vector<8x256xf32>
    %18 = arith.addf %15, %17 : vector<8x256xf32>
    %cst_14 = arith.constant 0.000000e+00 : f32
    %19 = vector.broadcast %cst_14 : f32 to vector<8x256xf32>
    %20 = arith.maximumf %18, %19 : vector<8x256xf32>
    %21 = arith.truncf %20 : vector<8x256xf32> to vector<8x256xbf16>
    %c256_15 = arith.constant 256 : index
    %c0_16 = arith.constant 0 : index
    %22 = vector.load %arg4[%c256_15, %c0_16] : memref<1024x512xbf16, #tpu.memory_space<vmem>>, vector<256x512xbf16>
    %cst_17 = arith.constant dense<0.000000e+00> : vector<8x512xf32>
    %23 = tpu.matmul %21, %22, %cst_17 {dimension_numbers = #tpu.dot_dimension_numbers<[1], [0], [0], [1], [0, 0, 1, 1], [], []>} : vector<8x256xbf16>, vector<256x512xbf16>, vector<8x512xf32> -> vector<8x512xf32>
    %24 = arith.addf %13, %23 : vector<8x512xf32>
    %c0_18 = arith.constant 0 : index
    %c512 = arith.constant 512 : index
    %25 = vector.load %arg2[%c0_18, %c512] : memref<32x1024xbf16, #tpu.memory_space<vmem>>, vector<32x256xbf16>
    %cst_19 = arith.constant dense<0.000000e+00> : vector<8x256xf32>
    %26 = tpu.matmul %1, %25, %cst_19 {dimension_numbers = #tpu.dot_dimension_numbers<[1], [0], [0], [1], [0, 0, 1, 1], [], []>} : vector<8x32xbf16>, vector<32x256xbf16>, vector<8x256xf32> -> vector<8x256xf32>
    %c0_20 = arith.constant 0 : index
    %c512_21 = arith.constant 512 : index
    %27 = vector.load %arg3[%c0_20, %c512_21] : memref<1x1024xf32, #tpu.memory_space<vmem>>, vector<1x256xf32>
    %28 = vector.broadcast %27 : vector<1x256xf32> to vector<8x256xf32>
    %29 = arith.addf %26, %28 : vector<8x256xf32>
    %cst_22 = arith.constant 0.000000e+00 : f32
    %30 = vector.broadcast %cst_22 : f32 to vector<8x256xf32>
    %31 = arith.maximumf %29, %30 : vector<8x256xf32>
    %32 = arith.truncf %31 : vector<8x256xf32> to vector<8x256xbf16>
    %c512_23 = arith.constant 512 : index
    %c0_24 = arith.constant 0 : index
    %33 = vector.load %arg4[%c512_23, %c0_24] : memref<1024x512xbf16, #tpu.memory_space<vmem>>, vector<256x512xbf16>
    %cst_25 = arith.constant dense<0.000000e+00> : vector<8x512xf32>
    %34 = tpu.matmul %32, %33, %cst_25 {dimension_numbers = #tpu.dot_dimension_numbers<[1], [0], [0], [1], [0, 0, 1, 1], [], []>} : vector<8x256xbf16>, vector<256x512xbf16>, vector<8x512xf32> -> vector<8x512xf32>
    %35 = arith.addf %24, %34 : vector<8x512xf32>
    %c0_26 = arith.constant 0 : index
    %c768 = arith.constant 768 : index
    %36 = vector.load %arg2[%c0_26, %c768] : memref<32x1024xbf16, #tpu.memory_space<vmem>>, vector<32x256xbf16>
    %cst_27 = arith.constant dense<0.000000e+00> : vector<8x256xf32>
    %37 = tpu.matmul %1, %36, %cst_27 {dimension_numbers = #tpu.dot_dimension_numbers<[1], [0], [0], [1], [0, 0, 1, 1], [], []>} : vector<8x32xbf16>, vector<32x256xbf16>, vector<8x256xf32> -> vector<8x256xf32>
    %c0_28 = arith.constant 0 : index
    %c768_29 = arith.constant 768 : index
    %38 = vector.load %arg3[%c0_28, %c768_29] : memref<1x1024xf32, #tpu.memory_space<vmem>>, vector<1x256xf32>
    %39 = vector.broadcast %38 : vector<1x256xf32> to vector<8x256xf32>
    %40 = arith.addf %37, %39 : vector<8x256xf32>
    %cst_30 = arith.constant 0.000000e+00 : f32
    %41 = vector.broadcast %cst_30 : f32 to vector<8x256xf32>
    %42 = arith.maximumf %40, %41 : vector<8x256xf32>
    %43 = arith.truncf %42 : vector<8x256xf32> to vector<8x256xbf16>
    %c768_31 = arith.constant 768 : index
    %c0_32 = arith.constant 0 : index
    %44 = vector.load %arg4[%c768_31, %c0_32] : memref<1024x512xbf16, #tpu.memory_space<vmem>>, vector<256x512xbf16>
    %cst_33 = arith.constant dense<0.000000e+00> : vector<8x512xf32>
    %45 = tpu.matmul %43, %44, %cst_33 {dimension_numbers = #tpu.dot_dimension_numbers<[1], [0], [0], [1], [0, 0, 1, 1], [], []>} : vector<8x256xbf16>, vector<256x512xbf16>, vector<8x512xf32> -> vector<8x512xf32>
    %46 = arith.addf %35, %45 : vector<8x512xf32>
    %c0_34 = arith.constant 0 : index
    %c0_35 = arith.constant 0 : index
    %47 = vector.load %arg5[%c0_34, %c0_35] : memref<1x512xf32, #tpu.memory_space<vmem>>, vector<1x512xf32>
    %48 = vector.broadcast %47 : vector<1x512xf32> to vector<8x512xf32>
    %49 = arith.addf %46, %48 : vector<8x512xf32>
    %cst_36 = arith.constant 0.000000e+00 : f32
    %50 = vector.broadcast %cst_36 : f32 to vector<8x512xf32>
    %51 = arith.maximumf %49, %50 : vector<8x512xf32>
    %52 = arith.truncf %51 : vector<8x512xf32> to vector<8x512xbf16>
    %c0_37 = arith.constant 0 : index
    %c0_38 = arith.constant 0 : index
    %53 = vector.load %arg6[%c0_37, %c0_38] : memref<512x256xbf16, #tpu.memory_space<vmem>>, vector<512x256xbf16>
    %cst_39 = arith.constant dense<0.000000e+00> : vector<8x256xf32>
    %54 = tpu.matmul %52, %53, %cst_39 {dimension_numbers = #tpu.dot_dimension_numbers<[1], [0], [0], [1], [0, 0, 1, 1], [], []>} : vector<8x512xbf16>, vector<512x256xbf16>, vector<8x256xf32> -> vector<8x256xf32>
    %c0_40 = arith.constant 0 : index
    %c0_41 = arith.constant 0 : index
    %55 = vector.load %arg7[%c0_40, %c0_41] : memref<1x256xf32, #tpu.memory_space<vmem>>, vector<1x256xf32>
    %56 = vector.broadcast %55 : vector<1x256xf32> to vector<8x256xf32>
    %57 = arith.addf %54, %56 : vector<8x256xf32>
    %cst_42 = arith.constant 0.000000e+00 : f32
    %58 = vector.broadcast %cst_42 : f32 to vector<8x256xf32>
    %59 = arith.maximumf %57, %58 : vector<8x256xf32>
    %60 = arith.truncf %59 : vector<8x256xf32> to vector<8x256xbf16>
    %c0_43 = arith.constant 0 : index
    %c0_44 = arith.constant 0 : index
    %61 = vector.load %arg8[%c0_43, %c0_44] : memref<256x128xbf16, #tpu.memory_space<vmem>>, vector<256x128xbf16>
    %cst_45 = arith.constant dense<0.000000e+00> : vector<8x128xf32>
    %62 = tpu.matmul %60, %61, %cst_45 {dimension_numbers = #tpu.dot_dimension_numbers<[1], [0], [0], [1], [0, 0, 1, 1], [], []>} : vector<8x256xbf16>, vector<256x128xbf16>, vector<8x128xf32> -> vector<8x128xf32>
    %c0_46 = arith.constant 0 : index
    %c0_47 = arith.constant 0 : index
    %63 = vector.load %arg9[%c0_46, %c0_47] : memref<1x128xf32, #tpu.memory_space<vmem>>, vector<1x128xf32>
    %64 = vector.broadcast %63 : vector<1x128xf32> to vector<8x128xf32>
    %65 = arith.addf %62, %64 : vector<8x128xf32>
    %cst_48 = arith.constant 0.000000e+00 : f32
    %66 = vector.broadcast %cst_48 : f32 to vector<8x128xf32>
    %67 = arith.maximumf %65, %66 : vector<8x128xf32>
    %68 = arith.truncf %67 : vector<8x128xf32> to vector<8x128xbf16>
    %c0_49 = arith.constant 0 : index
    %c0_50 = arith.constant 0 : index
    %69 = vector.load %arg10[%c0_49, %c0_50] : memref<128x64xbf16, #tpu.memory_space<vmem>>, vector<128x64xbf16>
    %cst_51 = arith.constant dense<0.000000e+00> : vector<8x64xf32>
    %70 = tpu.matmul %68, %69, %cst_51 {dimension_numbers = #tpu.dot_dimension_numbers<[1], [0], [0], [1], [0, 0, 1, 1], [], []>} : vector<8x128xbf16>, vector<128x64xbf16>, vector<8x64xf32> -> vector<8x64xf32>
    %c0_52 = arith.constant 0 : index
    %c0_53 = arith.constant 0 : index
    %71 = vector.load %arg11[%c0_52, %c0_53] : memref<1x64xf32, #tpu.memory_space<vmem>>, vector<1x64xf32>
    %72 = vector.broadcast %71 : vector<1x64xf32> to vector<8x64xf32>
    %73 = arith.addf %70, %72 : vector<8x64xf32>
    %cst_54 = arith.constant 0.000000e+00 : f32
    %74 = vector.broadcast %cst_54 : f32 to vector<8x64xf32>
    %75 = arith.maximumf %73, %74 : vector<8x64xf32>
    %76 = arith.truncf %75 : vector<8x64xf32> to vector<8x64xbf16>
    %77 = arith.extf %76 : vector<8x64xbf16> to vector<8x64xf32>
    %c0_55 = arith.constant 0 : index
    %c0_56 = arith.constant 0 : index
    %78 = vector.load %arg12[%c0_55, %c0_56] : memref<1x64xf32, #tpu.memory_space<vmem>>, vector<1x64xf32>
    %79 = vector.broadcast %78 : vector<1x64xf32> to vector<8x64xf32>
    %80 = arith.mulf %77, %79 : vector<8x64xf32>
    %cst_57 = arith.constant dense<0.000000e+00> : vector<8xf32>
    %81 = vector.multi_reduction <add>, %80, %cst_57 [1] : vector<8x64xf32> to vector<8xf32>
    %82 = vector.shape_cast %81 : vector<8xf32> to vector<8x1xf32>
    %c0_58 = arith.constant 0 : index
    %c0_59 = arith.constant 0 : index
    %83 = vector.load %arg13[%c0_58, %c0_59] : memref<1x1xf32, #tpu.memory_space<vmem>>, vector<1x1xf32>
    %84 = vector.broadcast %83 : vector<1x1xf32> to vector<8x1xf32>
    %85 = arith.addf %82, %84 : vector<8x1xf32>
    %86 = arith.negf %85 : vector<8x1xf32>
    %87 = math.exp %86 : vector<8x1xf32>
    %cst_60 = arith.constant 1.000000e+00 : f32
    %88 = vector.broadcast %cst_60 : f32 to vector<8x1xf32>
    %89 = arith.addf %88, %87 : vector<8x1xf32>
    %90 = arith.divf %88, %89 : vector<8x1xf32>
    %c0_61 = arith.constant 0 : index
    %c0_62 = arith.constant 0 : index
    %91 = vector.load %arg14[%c0_61, %c0_62] : memref<8x1xf32, #tpu.memory_space<vmem>>, vector<8x1xf32>
    tpu.vector_store %arg14[%c0_61, %c0_62], %90 {strides = array<i32>} : memref<8x1xf32, #tpu.memory_space<vmem>>, vector<8x1xf32>,
    return
  }
  func.func @transform_0(%arg0: i32) -> (i32, i32) {
    %c0_i32 = arith.constant 0 : i32
    %c0_i32_0 = arith.constant 0 : i32
    return %arg0, %c0_i32 : i32, i32
  }
  func.func @transform_1(%arg0: i32) -> (i32, i32) {
    %c0_i32 = arith.constant 0 : i32
    %c0_i32_0 = arith.constant 0 : i32
    %c0_i32_1 = arith.constant 0 : i32
    return %c0_i32, %c0_i32_0 : i32, i32
  }
  func.func @transform_2(%arg0: i32) -> (i32, i32) {
    %c0_i32 = arith.constant 0 : i32
    %c0_i32_0 = arith.constant 0 : i32
    %c0_i32_1 = arith.constant 0 : i32
    return %c0_i32, %c0_i32_0 : i32, i32
  }
  func.func @transform_3(%arg0: i32) -> (i32, i32) {
    %c0_i32 = arith.constant 0 : i32
    %c0_i32_0 = arith.constant 0 : i32
    %c0_i32_1 = arith.constant 0 : i32
    return %c0_i32, %c0_i32_0 : i32, i32
  }
  func.func @transform_4(%arg0: i32) -> (i32, i32) {
    %c0_i32 = arith.constant 0 : i32
    %c0_i32_0 = arith.constant 0 : i32
    %c0_i32_1 = arith.constant 0 : i32
    return %c0_i32, %c0_i32_0 : i32, i32
  }
  func.func @transform_5(%arg0: i32) -> (i32, i32) {
    %c0_i32 = arith.constant 0 : i32
    %c0_i32_0 = arith.constant 0 : i32
    %c0_i32_1 = arith.constant 0 : i32
    return %c0_i32, %c0_i32_0 : i32, i32
  }
  func.func @transform_6(%arg0: i32) -> (i32, i32) {
    %c0_i32 = arith.constant 0 : i32
    %c0_i32_0 = arith.constant 0 : i32
    %c0_i32_1 = arith.constant 0 : i32
    return %c0_i32, %c0_i32_0 : i32, i32
  }
  func.func @transform_7(%arg0: i32) -> (i32, i32) {
    %c0_i32 = arith.constant 0 : i32
    %c0_i32_0 = arith.constant 0 : i32
    %c0_i32_1 = arith.constant 0 : i32
    return %c0_i32, %c0_i32_0 : i32, i32
  }
  func.func @transform_8(%arg0: i32) -> (i32, i32) {
    %c0_i32 = arith.constant 0 : i32
    %c0_i32_0 = arith.constant 0 : i32
    %c0_i32_1 = arith.constant 0 : i32
    return %c0_i32, %c0_i32_0 : i32, i32
  }
  func.func @transform_9(%arg0: i32) -> (i32, i32) {
    %c0_i32 = arith.constant 0 : i32
    %c0_i32_0 = arith.constant 0 : i32
    %c0_i32_1 = arith.constant 0 : i32
    return %c0_i32, %c0_i32_0 : i32, i32
  }
  func.func @transform_10(%arg0: i32) -> (i32, i32) {
    %c0_i32 = arith.constant 0 : i32
    %c0_i32_0 = arith.constant 0 : i32
    %c0_i32_1 = arith.constant 0 : i32
    return %c0_i32, %c0_i32_0 : i32, i32
  }
  func.func @transform_11(%arg0: i32) -> (i32, i32) {
    %c0_i32 = arith.constant 0 : i32
    %c0_i32_0 = arith.constant 0 : i32
    %c0_i32_1 = arith.constant 0 : i32
    return %c0_i32, %c0_i32_0 : i32, i32
  }
  func.func @transform_12(%arg0: i32) -> (i32, i32) {
    %c0_i32 = arith.constant 0 : i32
    %c0_i32_0 = arith.constant 0 : i32
    %c0_i32_1 = arith.constant 0 : i32
    return %c0_i32, %c0_i32_0 : i32, i32
  }
  func.func @transform_13(%arg0: i32) -> (i32, i32) {
    %c0_i32 = arith.constant 0 : i32
    %c0_i32_0 = arith.constant 0 : i32
    return %arg0, %c0_i32 : i32, i32
  }
}

</mosaic_0001>

<bundles_post_ra>
// kernel: tpu_custom_call.1
= control target key start
LH: loop header
LB: loop body
LE: loop exit
PB: predicated region body
PF: predicated region fallthrough
CT: control target
= control target key end

     0   :  { %s5063_s0 = inlined_call_operand.vmem [shape: f32[16,32], index: 0, kind: input, shape index: {}]   ;;  %s5064_s1 = inlined_call_operand.hbm [shape: bf16[32,1024], index: 1, kind: input, shape index: {}]   ;;  %s5065_s2 = inlined_call_operand.vmem [shape: f32[1,1024], index: 2, kind: input, shape index: {}]   ;;  %s5066_s3 = inlined_call_operand.hbm [shape: bf16[1024,512], index: 3, kind: input, shape index: {}]   ;;  %s5067_s4 = inlined_call_operand.vmem [shape: f32[1,512], index: 4, kind: input, shape index: {}]   ;;  %s5068_s5 = inlined_call_operand.hbm [shape: bf16[512,256], index: 5, kind: input, shape index: {}]   ;;  %s5069_s6 = inlined_call_operand.vmem [shape: f32[1,256], index: 6, kind: input, shape index: {}]   ;;  %s5070_s7 = inlined_call_operand.hbm [shape: bf16[256,128], index: 7, kind: input, shape index: {}]   ;;  %s5071_s8 = inlined_call_operand.vmem [shape: f32[1,128], index: 8, kind: input, shape index: {}]   ;;  %s5072_s9 = inlined_call_operand.vmem [shape: bf16[128,64], index: 9, kind: input, shape index: {}]   ;;  %s5073_s10 = inlined_call_operand.vmem [shape: f32[1,64], index: 10, kind: input, shape index: {}]   ;;  %s5074_s11 = inlined_call_operand.vmem [shape: f32[1,64], index: 11, kind: input, shape index: {}]   ;;  %s5075_s12 = inlined_call_operand.<no memory space> [shape: f32[1,1], index: 12, kind: input, shape index: {}]   ;;  %s5076_s13 = inlined_call_operand.vmem [shape: f32[16,1], index: 13, kind: output, shape index: {}]  }
   0x1   :  { %v18_v0 = vstv %s5075_s12 }
   0x2   :  { %19 = vst [vmem:[#allocation2] sm:$0x1] %v18_v0 }
   0x3   :  { %20 = vsyncpa [#allocation4], 0 }
   0x4   :  { %21 = vsyncpa [#allocation6], 0 }
   0x5   :  { %22 = vsyncpa [#allocation9], 0  ;;  %s4846_s27 = smov 0  }
   0x6 LB: > { %s4758_s28 = smov [#allocation5]   ;;  %s4852_s30 = sadd.s32 4294967295, %s4756_s27   ;;  %s4756_s27 = sphi %s4846_s27, %s28_s27  }
   0x7   : > { %s365_s29 = sshll.u32 %s4758_s28, 4  ;;  %p3631_p0 = scmp.ge.s32.totalorder %s4756_s27, 1  ;;  %s366_s29 = int_to_ptr.vmem [resolvable:$true] %s365_s29 }
   0x8   : > { %p337_p1 = scmp.lt.s32.totalorder %s4756_s27, 3  ;;  %p4095_p2 = scmp.eq.s32.totalorder %s4852_s30, 0 }
   0x9   : > { %s4759_s14 = smov [#allocation3]   ;;  %s4760_s17 = smov [#allocation7]  }
   0xa   : > { %p4857_p3 = pnand %p3631_p0, %p337_p1  ;;  %s349_s15 = sshll.u32 %s4759_s14, 4  ;;  %s4863_s15 = int_to_ptr.vmem [resolvable:$true] %s349_s15 }
   0xb   : > { %s4871_s18 = sshll.u32 %s4760_s17, 4  ;;  %s4645_s19 = scalar_lea.vmem %s366_s29, 32768  ;;  %s382_s18 = int_to_ptr.vmem [resolvable:$true] %s4871_s18 }
   0xc   : > { %p4082_p4 = pneg %p4857_p3  ;;  %p4646_p7 = scmp.ne.s32.totalorder %s366_s29, %s4645_s19 }
   0xd   : > { %p4653_p10 = scmp.lt.s32.totalorder %s366_s29, %s366_s29  ;;  %p4654_p11 = scmp.lt.s32.totalorder %s4645_s19, %s4645_s19 }
   0xe   : > { %p4867_p5 = pnand %p4095_p2, %p4082_p4 }
   0xf   : > { %p4655_p12 = por %p4654_p11, %p4653_p10 }
  0x10   : > { %p4636_p6 = pneg %p4867_p5 }
  0x12   : > { %p4648_p8 = pnand %p4646_p7, %p4636_p6 }
  0x14   : > { %p4649_p9 = pneg %p4648_p8 }
  0x16   : > { %p4656_p13 = pnand %p4655_p12, %p4649_p9 }
  0x18   : > { %4659 = shalt.err (!%p4656_p13)
}
  0x19   : > { %s4761_s20 = smov 256   ;;  %s4762_s21 = smov 16  }
  0x1a   : > { %4088 = dma.hbm_to_vmem [thread:$0]  (!%p4867_p5), %s5066_s3, 32768, %s366_s29, [#allocation6], %s4761_s20, %s4761_s20, %s4762_s21  }
  0x1b   : > { %s4671_s24 = scalar_lea.vmem %s4863_s15, 2048  ;;  %p4679_p7 = scmp.lt.s32.totalorder %s4863_s15, %s4863_s15 }
  0x1c   : > { %p4672_p0 = scmp.ne.s32.totalorder %s4863_s15, %s4671_s24  ;;  %p4680_p8 = scmp.lt.s32.totalorder %s4671_s24, %s4671_s24 }
  0x1e   : > { %p4674_p1 = pnand %p4672_p0, %p4636_p6  ;;  %p4681_p9 = por %p4680_p8, %p4679_p7 }
  0x20   : > { %p4675_p4 = pneg %p4674_p1 }
  0x22   : > { %p4682_p10 = pnand %p4681_p9, %p4675_p4 }
  0x24   : > { %4685 = shalt.err (!%p4682_p10)
}
  0x25   : > { %s4763_s25 = smov 512   ;;  %s4764_s26 = smov 32  }
  0x26   : > { %4085 = dma.hbm_to_vmem [thread:$0]  (!%p4867_p5), %s5064_s1, 2048, %s4863_s15, [#allocation4], %s4763_s25, %s4763_s25, %s4764_s26  }
  0x27   : > { %s4697_s14 = scalar_lea.vmem %s382_s18, 8192  ;;  %p4705_p0 = scmp.lt.s32.totalorder %s382_s18, %s382_s18 }
  0x28   : > { %p4698_p11 = scmp.ne.s32.totalorder %s382_s18, %s4697_s14  ;;  %p4706_p1 = scmp.lt.s32.totalorder %s4697_s14, %s4697_s14 }
  0x2a   : > { %p4700_p12 = pnand %p4698_p11, %p4636_p6  ;;  %p4707_p4 = por %p4706_p1, %p4705_p0 }
  0x2c   : > { %p4701_p13 = pneg %p4700_p12 }
  0x2e   : > { %p4708_p7 = pnand %p4707_p4, %p4701_p13 }
  0x30   : > { %4711 = shalt.err (!%p4708_p7)
}
  0x31   : > { %s4765_s17 = smov 128   ;;  %s4766_s19 = smov 8  }
  0x32   : > { %4091 = dma.hbm_to_vmem [thread:$0]  (!%p4867_p5), %s5068_s5, 8192, %s382_s18, [#allocation6], %s4765_s17, %s4765_s17, %s4766_s19  }
  0x33   : > { %s4767_s15 = smov [#allocation8]  }
  0x34   : > { %s397_s22 = sshll.u32 %s4767_s15, 4  ;;  %s398_s22 = int_to_ptr.vmem [resolvable:$true] %s397_s22 }
  0x35   : > { %s4723_s23 = scalar_lea.vmem %s398_s22, 2048  ;;  %p4731_p11 = scmp.lt.s32.totalorder %s398_s22, %s398_s22 }
  0x36   : > { %p4724_p8 = scmp.ne.s32.totalorder %s398_s22, %s4723_s23  ;;  %p4732_p12 = scmp.lt.s32.totalorder %s4723_s23, %s4723_s23 }
  0x38   : > { %p4726_p9 = pnand %p4724_p8, %p4636_p6  ;;  %p4733_p13 = por %p4732_p12, %p4731_p11 }
  0x3a   : > { %p4727_p10 = pneg %p4726_p9 }
  0x3c   : > { %p4734_p0 = pnand %p4733_p13, %p4727_p10 }
  0x3e   : > { %4737 = shalt.err (!%p4734_p0)
}
  0x3f   : > { %s4768_s24 = smov 64   ;;  %s4769_s25 = smov 4  }
  0x40   : > { %4094 = dma.hbm_to_vmem [thread:$0]  (!%p4867_p5), %s5070_s7, 2048, %s398_s22, [#allocation9], %s4768_s24, %s4768_s24, %s4769_s25  }
  0x41   : > { %435 = sbr.rel (%p4857_p3) target bundleno = 1761 (0x6e1), region = 72 }
  0x46   : > { %4743 = dma.done.wait (%p4095_p2), [#allocation4], 2048  }
  0x47   : > { %4745 = vsyncadd (%p4095_p2), [#allocation4], 4294965248 }
  0x48   : > { %4747 = dma.done.wait (%p4095_p2), [#allocation6], 40960  }
  0x49   : > { %4749 = vsyncadd (%p4095_p2), [#allocation6], 4294926336 }
  0x4a   : > { %4751 = dma.done.wait (%p4095_p2), [#allocation9], 2048  }
  0x4b   : > { %4753 = vsyncadd (%p4095_p2), [#allocation9], 4294965248  ;;  %p489_p3 = scmp.lt.s32.totalorder %s4852_s30, 1  ;;  %v4770_v1 = vmov 0   ;;  %v651_v2 = vld [vmem:[#allocation3 + $0x48] sm:$0xff]  ;;  %v502_v8 = vld [vmem:[#allocation3 + $0x40] sm:$0xff] }
  0x4c   : > { %717 = vmatprep.mubr.bf16.mxu1 %v4770_v1  ;;  %572 = vmatprep.mubr.bf16.mxu0 %v4770_v1  ;;  %v652_v3 = vld [vmem:[#allocation3 + $0x68] sm:$0xff]  ;;  %v503_v10 = vld [vmem:[#allocation3 + $0x60] sm:$0xff]  ;;  %vm536_vm0 = vcmask 261120   ;;  %vm4772_vm1 = vmmov 0   ;;  %vm3515_vm2 = vcmask 523264   ;;  %vm3533_vm3 = vcmask 7168  }
  0x4d   : > { %s5080_s30 = smov (!%p489_p3, %s4852_s30), 1  ;;  %v649_v4 = vld [vmem:[#allocation3 + $0x8] sm:$0xff]  ;;  %v3652_v5 = vcombine.high %v651_v2, %v652_v3  ;;  %v3651_v6 = vcombine.low %v651_v2, %v652_v3  ;;  %v500_v11 = vld [vmem:[#allocation3] sm:$0xff]  ;;  %v3647_v13 = vcombine.high %v502_v8, %v503_v10  ;;  %v3646_v14 = vcombine.low %v502_v8, %v503_v10 }
  0x4e   : > { %s3642_s12 = sshll.u32 %s5080_s30, 3  ;;  %v650_v7 = vld [vmem:[#allocation3 + $0x28] sm:$0xff]  ;;  %v501_v12 = vld [vmem:[#allocation3 + $0x20] sm:$0xff] }
  0x4f   : > { %s492_s29 = scalar_lea.vmem %s5063_s0, %s3642_s12  ;;  %v3650_v9 = vcombine.high %v649_v4, %v650_v7  ;;  %697 = vmatprep.subr.bf16.mxu1 %v3652_v5  ;;  %v3645_v15 = vcombine.high %v500_v11, %v501_v12  ;;  %v3649_v16 = vcombine.low %v649_v4, %v650_v7  ;;  %552 = vmatprep.subr.bf16.mxu0 %v3647_v13  ;;  %v4131_v18 = vld [vmem:[#allocation5 + $0x2ec] ss:$16 sps:$4 sm:$0xff]   ;;  %v4128_v21 = vld [vmem:[#allocation5 + $0x2e4] ss:$16 sps:$4 sm:$0xff]   ;;  %v4129_v22 = vld [vmem:[#allocation5 + $0x2e8] ss:$16 sps:$4 sm:$0xff]   ;;  %s496_s22 = scalar_lea.vmem %s5076_s13, %s3642_s12 }
  0x50   : > { %698 = vmatpush1.bf16.msra.mxu1 %v3651_v6  ;;  %v498_v17 = vld [vmem:[%s492_s29] sm:$0xff]  ;;  %553 = vmatpush1.bf16.msra.mxu0 %v3646_v14  ;;  %v3644_v19 = vcombine.low %v500_v11, %v501_v12  ;;  %v4135_v26 = vld [vmem:[#allocation5 + $0x2c8] ss:$16 sps:$4 sm:$0xff]  }
  0x51   : > { %699 = vmatprep.subr.bf16.mxu1 %v3650_v9  ;;  %v4939_v20 = vpack.c.bf16 %v498_v17, %v498_v17  ;;  %554 = vmatprep.subr.bf16.mxu0 %v3645_v15  ;;  %v4137_v23 = vld [vmem:[#allocation5 + $0x2cc] ss:$16 sps:$4 sm:$0xff]   ;;  %v4126_v24 = vld [vmem:[#allocation5 + $0x2e0] ss:$16 sps:$4 sm:$0xff]   ;;  %v4134_v25 = vld [vmem:[#allocation5 + $0x2c4] ss:$16 sps:$4 sm:$0xff]  }
  0x52   : > { %v4143_v27 = vld [vmem:[#allocation5 + $0x2ac] ss:$16 sps:$4 sm:$0xff]   ;;  %v4132_v28 = vld [vmem:[#allocation5 + $0x2c0] ss:$16 sps:$4 sm:$0xff]   ;;  %v4140_v29 = vld [vmem:[#allocation5 + $0x2a4] ss:$16 sps:$4 sm:$0xff]  }
  0x53   : > { %v4141_v30 = vld [vmem:[#allocation5 + $0x2a8] ss:$16 sps:$4 sm:$0xff]   ;;  %v4149_v31 = vld [vmem:[#allocation5 + $0x28c] ss:$16 sps:$4 sm:$0xff]   ;;  %v4138_v32 = vld [vmem:[#allocation5 + $0x2a0] ss:$16 sps:$4 sm:$0xff]  }
  0x54   : > { %700 = vmatpush1.bf16.msra.mxu1 %v3649_v16  ;;  %555 = vmatpush1.bf16.msra.mxu0 %v3644_v19  ;;  %v4146_v33 = vld [vmem:[#allocation5 + $0x284] ss:$16 sps:$4 sm:$0xff]   ;;  %v4147_v34 = vld [vmem:[#allocation5 + $0x288] ss:$16 sps:$4 sm:$0xff]   ;;  %v4155_v35 = vld [vmem:[#allocation5 + $0x26c] ss:$16 sps:$4 sm:$0xff]  }
  0x55   : > { %1155 = vmatprep.subr.bf16.mxu1 %v4131_v18  ;;  %1114 = vmatprep.subr.bf16.mxu0 %v4128_v21  ;;  %v4144_v36 = vld [vmem:[#allocation5 + $0x280] ss:$16 sps:$4 sm:$0xff]   ;;  %v4152_v37 = vld [vmem:[#allocation5 + $0x264] ss:$16 sps:$4 sm:$0xff]   ;;  %v4153_v38 = vld [vmem:[#allocation5 + $0x268] ss:$16 sps:$4 sm:$0xff]  }
  0x56   : > { %v4161_v39 = vld [vmem:[#allocation5 + $0x24c] ss:$16 sps:$4 sm:$0xff]   ;;  %v4150_v40 = vld [vmem:[#allocation5 + $0x260] ss:$16 sps:$4 sm:$0xff]   ;;  %v4158_v41 = vld [vmem:[#allocation5 + $0x244] ss:$16 sps:$4 sm:$0xff]  }
  0x57   : > { %3653 = vmatmul.mubr.msk.bf16.vlgmr.msra.gmra.mxu1 %vm536_vm0, %v4939_v20  ;;  %3648 = vmatmul.mubr.msk.bf16.vlgmr.msra.gmra.mxu0 %vm536_vm0, %v4939_v20  ;;  %v4159_v42 = vld [vmem:[#allocation5 + $0x248] ss:$16 sps:$4 sm:$0xff]   ;;  %v4167_v43 = vld [vmem:[#allocation5 + $0x22c] ss:$16 sps:$4 sm:$0xff]   ;;  %v4156_v44 = vld [vmem:[#allocation5 + $0x240] ss:$16 sps:$4 sm:$0xff]  }
  0x58   : > { %1156 = vmatpush1.bf16.msra.mxu1 %v4129_v22  ;;  %1115 = vmatpush1.bf16.msra.mxu0 %v4126_v24  ;;  %v4164_v45 = vld [vmem:[#allocation5 + $0x224] ss:$16 sps:$4 sm:$0xff]   ;;  %v4165_v46 = vld [vmem:[#allocation5 + $0x228] ss:$16 sps:$4 sm:$0xff]   ;;  %v4173_v47 = vld [vmem:[#allocation5 + $0x20c] ss:$16 sps:$4 sm:$0xff]   ;;  %v506_v24 = vlaneseq }
  0x59   : > { %1157 = vmatprep.subr.bf16.mxu1 %v4137_v23  ;;  %1116 = vmatprep.subr.bf16.mxu0 %v4134_v25  ;;  %v4162_v48 = vld [vmem:[#allocation5 + $0x220] ss:$16 sps:$4 sm:$0xff]   ;;  %v4170_v49 = vld [vmem:[#allocation5 + $0x204] ss:$16 sps:$4 sm:$0xff]   ;;  %v4171_v50 = vld [vmem:[#allocation5 + $0x208] ss:$16 sps:$4 sm:$0xff]  }
  0x5a   : > { %v4179_v51 = vld [vmem:[#allocation5 + $0x3ec] ss:$16 sps:$4 sm:$0xff]   ;;  %v4168_v52 = vld [vmem:[#allocation5 + $0x200] ss:$16 sps:$4 sm:$0xff]   ;;  %v4176_v53 = vld [vmem:[#allocation5 + $0x3e4] ss:$16 sps:$4 sm:$0xff]  }
  0x5b   : > { %v4174_v54 = vld [vmem:[#allocation5 + $0x3e0] ss:$16 sps:$4 sm:$0xff]   ;;  %v4177_v55 = vld [vmem:[#allocation5 + $0x3e8] ss:$16 sps:$4 sm:$0xff]   ;;  %v4185_v56 = vld [vmem:[#allocation5 + $0x3cc] ss:$16 sps:$4 sm:$0xff]  }
  0x5c   : > { %1158 = vmatpush1.bf16.msra.mxu1 %v4135_v26  ;;  %1117 = vmatpush1.bf16.msra.mxu0 %v4132_v28  ;;  %v4182_v57 = vld [vmem:[#allocation5 + $0x3c4] ss:$16 sps:$4 sm:$0xff]   ;;  %v4183_v58 = vld [vmem:[#allocation5 + $0x3c8] ss:$16 sps:$4 sm:$0xff]   ;;  %v4191_v59 = vld [vmem:[#allocation5 + $0x3ac] ss:$16 sps:$4 sm:$0xff]  }
  0x5d   : > { %1159 = vmatprep.subr.bf16.mxu1 %v4143_v27  ;;  %1118 = vmatprep.subr.bf16.mxu0 %v4140_v29  ;;  %v4180_v60 = vld [vmem:[#allocation5 + $0x3c0] ss:$16 sps:$4 sm:$0xff]   ;;  %v4188_v61 = vld [vmem:[#allocation5 + $0x3a4] ss:$16 sps:$4 sm:$0xff]   ;;  %v4189_v62 = vld [vmem:[#allocation5 + $0x3a8] ss:$16 sps:$4 sm:$0xff]  }
  0x5e   : > { %v4197_v63 = vld [vmem:[#allocation5 + $0x38c] ss:$16 sps:$4 sm:$0xff]   ;;  %v4186_v0 = vld [vmem:[#allocation5 + $0x3a0] ss:$16 sps:$4 sm:$0xff]   ;;  %v4194_v2 = vld [vmem:[#allocation5 + $0x384] ss:$16 sps:$4 sm:$0xff]  }
  0x5f   : > { %v4195_v3 = vld [vmem:[#allocation5 + $0x388] ss:$16 sps:$4 sm:$0xff]   ;;  %v4203_v4 = vld [vmem:[#allocation5 + $0x36c] ss:$16 sps:$4 sm:$0xff]   ;;  %v4192_v5 = vld [vmem:[#allocation5 + $0x380] ss:$16 sps:$4 sm:$0xff]  }
  0x60   : > { %1160 = vmatpush1.bf16.msra.mxu1 %v4141_v30  ;;  %1119 = vmatpush1.bf16.msra.mxu0 %v4138_v32  ;;  %v4200_v6 = vld [vmem:[#allocation5 + $0x364] ss:$16 sps:$4 sm:$0xff]   ;;  %v4201_v7 = vld [vmem:[#allocation5 + $0x368] ss:$16 sps:$4 sm:$0xff]   ;;  %v4209_v8 = vld [vmem:[#allocation5 + $0x34c] ss:$16 sps:$4 sm:$0xff]  }
  0x61   : > { %1161 = vmatprep.subr.bf16.mxu1 %v4149_v31  ;;  %1120 = vmatprep.subr.bf16.mxu0 %v4146_v33  ;;  %v4198_v9 = vld [vmem:[#allocation5 + $0x360] ss:$16 sps:$4 sm:$0xff]   ;;  %v4206_v10 = vld [vmem:[#allocation5 + $0x344] ss:$16 sps:$4 sm:$0xff]   ;;  %v4207_v11 = vld [vmem:[#allocation5 + $0x348] ss:$16 sps:$4 sm:$0xff]  }
  0x62   : > { %v4204_v12 = vld [vmem:[#allocation5 + $0x340] ss:$16 sps:$4 sm:$0xff]   ;;  %v4212_v13 = vld [vmem:[#allocation5 + $0x324] ss:$16 sps:$4 sm:$0xff]   ;;  %v4215_v14 = vld [vmem:[#allocation5 + $0x32c] ss:$16 sps:$4 sm:$0xff]  }
  0x63   : > { %v4210_v15 = vld [vmem:[#allocation5 + $0x320] ss:$16 sps:$4 sm:$0xff]   ;;  %v4213_v16 = vld [vmem:[#allocation5 + $0x328] ss:$16 sps:$4 sm:$0xff]   ;;  %v4218_v17 = vld [vmem:[#allocation5 + $0x304] ss:$16 sps:$4 sm:$0xff]  }
  0x64   : > { %1162 = vmatpush1.bf16.msra.mxu1 %v4147_v34  ;;  %1121 = vmatpush1.bf16.msra.mxu0 %v4144_v36  ;;  %v4221_v18 = vld [vmem:[#allocation5 + $0x30c] ss:$16 sps:$4 sm:$0xff]   ;;  %v4216_v19 = vld [vmem:[#allocation5 + $0x300] ss:$16 sps:$4 sm:$0xff]   ;;  %v4219_v21 = vld [vmem:[#allocation5 + $0x308] ss:$16 sps:$4 sm:$0xff]  }
  0x65   : > { %1163 = vmatprep.subr.bf16.mxu1 %v4155_v35  ;;  %1122 = vmatprep.subr.bf16.mxu0 %v4152_v37  ;;  %v4224_v22 = vld [vmem:[#allocation5 + $0xe4] ss:$16 sps:$4 sm:$0xff]   ;;  %v4227_v23 = vld [vmem:[#allocation5 + $0xec] ss:$16 sps:$4 sm:$0xff]   ;;  %v4945_v25 = vshrl.u32 %v506_v24, 7 }
  0x66   : > { %v653_v27 = vld [vmem:[%s5065_s2 + $0x2] sm:$0x3]  ;;  %v4960_v30 = vld [vmem:[%s5065_s2] sm:$0x3] }
  0x67   : > { %v4948_v26 = vsub.s32 0, %v4945_v25  ;;  %v4954_v28 = vsub.s32 1, %v4945_v25  ;;  %v4276_v24 = vld [vmem:[#allocation5 + $0x1c0] ss:$16 sps:$4 sm:$0xff]  }
  0x68   : > { %1164 = vmatpush1.bf16.msra.mxu1 %v4153_v38  ;;  %1123 = vmatpush1.bf16.msra.mxu0 %v4150_v40 }
  0x69   : > { %1165 = vmatprep.subr.bf16.mxu1 %v4161_v39  ;;  %1124 = vmatprep.subr.bf16.mxu0 %v4158_v41  ;;  %v658_v29 = vrot.slane %v653_v27, %v4948_v26  ;;  %v662_v31 = vrot.slane %v653_v27, %v4954_v28  ;;  %v513_v34 = vrot.slane %v4960_v30, %v4954_v28  ;;  %v4279_v27 = vld [vmem:[#allocation5 + $0x1c8] ss:$16 sps:$4 sm:$0xff]  }
  0x6c   : > { %1166 = vmatpush1.bf16.msra.mxu1 %v4159_v42  ;;  %1125 = vmatpush1.bf16.msra.mxu0 %v4156_v44 }
  0x6d   : > { %1167 = vmatprep.subr.bf16.mxu1 %v4167_v43  ;;  %1126 = vmatprep.subr.bf16.mxu0 %v4164_v45 }
  0x70   : > { %1168 = vmatpush1.bf16.msra.mxu1 %v4165_v46  ;;  %1127 = vmatpush1.bf16.msra.mxu0 %v4162_v48  ;;  %v4222_v46 = vld [vmem:[#allocation5 + $0xe0] ss:$16 sps:$4 sm:$0xff]  }
  0x71   : > { %1169 = vmatprep.subr.bf16.mxu1 %v4173_v47  ;;  %1128 = vmatprep.subr.bf16.mxu0 %v4170_v49  ;;  %v4225_v47 = vld [vmem:[#allocation5 + $0xe8] ss:$16 sps:$4 sm:$0xff]  }
  0x74   : > { %1170 = vmatpush1.bf16.msra.mxu1 %v4171_v50  ;;  %1129 = vmatpush1.bf16.msra.mxu0 %v4168_v52  ;;  %v4230_v50 = vld [vmem:[#allocation5 + $0xc4] ss:$16 sps:$4 sm:$0xff]  }
  0x75   : > { %1171 = vmatprep.subr.bf16.mxu1 %v4179_v51  ;;  %1130 = vmatprep.subr.bf16.mxu0 %v4176_v53  ;;  %v4233_v51 = vld [vmem:[#allocation5 + $0xcc] ss:$16 sps:$4 sm:$0xff]  }
  0x78   : > { %1172 = vmatpush2.bf16.msra.mxu1 %v4177_v55  ;;  %1131 = vmatpush2.bf16.msra.mxu0 %v4174_v54  ;;  %v4228_v54 = vld [vmem:[#allocation5 + $0xc0] ss:$16 sps:$4 sm:$0xff]   ;;  %v4231_v55 = vld [vmem:[#allocation5 + $0xc8] ss:$16 sps:$4 sm:$0xff]  }
  0x79   : > { %1173 = vmatprep.subr.bf16.mxu1 %v4185_v56  ;;  %1132 = vmatprep.subr.bf16.mxu0 %v4182_v57  ;;  %v4236_v56 = vld [vmem:[#allocation5 + $0xa4] ss:$16 sps:$4 sm:$0xff]   ;;  %v4239_v57 = vld [vmem:[#allocation5 + $0xac] ss:$16 sps:$4 sm:$0xff]  }
  0x7c   : > { %1174 = vmatpush2.bf16.msra.mxu1 %v4183_v58  ;;  %1133 = vmatpush2.bf16.msra.mxu0 %v4180_v60  ;;  %v4234_v58 = vld [vmem:[#allocation5 + $0xa0] ss:$16 sps:$4 sm:$0xff]   ;;  %v4242_v60 = vld [vmem:[#allocation5 + $0x84] ss:$16 sps:$4 sm:$0xff]  }
  0x7d   : > { %1175 = vmatprep.subr.bf16.mxu1 %v4191_v59  ;;  %1134 = vmatprep.subr.bf16.mxu0 %v4188_v61  ;;  %v4237_v59 = vld [vmem:[#allocation5 + $0xa8] ss:$16 sps:$4 sm:$0xff]   ;;  %v4245_v61 = vld [vmem:[#allocation5 + $0x8c] ss:$16 sps:$4 sm:$0xff]  }
  0x80   : > { %1176 = vmatpush2.bf16.msra.mxu1 %v4189_v62  ;;  %1135 = vmatpush2.bf16.msra.mxu0 %v4186_v0  ;;  %v4240_v62 = vld [vmem:[#allocation5 + $0x80] ss:$16 sps:$4 sm:$0xff]   ;;  %v4248_v0 = vld [vmem:[#allocation5 + $0x64] ss:$16 sps:$4 sm:$0xff]  }
  0x81   : > { %1177 = vmatprep.subr.bf16.mxu1 %v4197_v63  ;;  %1136 = vmatprep.subr.bf16.mxu0 %v4194_v2  ;;  %v4243_v63 = vld [vmem:[#allocation5 + $0x88] ss:$16 sps:$4 sm:$0xff]   ;;  %v4251_v2 = vld [vmem:[#allocation5 + $0x6c] ss:$16 sps:$4 sm:$0xff]  }
  0x84   : > { %1178 = vmatpush2.bf16.msra.mxu1 %v4195_v3  ;;  %1137 = vmatpush2.bf16.msra.mxu0 %v4192_v5  ;;  %v4246_v3 = vld [vmem:[#allocation5 + $0x60] ss:$16 sps:$4 sm:$0xff]   ;;  %v4254_v5 = vld [vmem:[#allocation5 + $0x44] ss:$16 sps:$4 sm:$0xff]  }
  0x85   : > { %1179 = vmatprep.subr.bf16.mxu1 %v4203_v4  ;;  %1138 = vmatprep.subr.bf16.mxu0 %v4200_v6  ;;  %v4249_v4 = vld [vmem:[#allocation5 + $0x68] ss:$16 sps:$4 sm:$0xff]   ;;  %v4257_v6 = vld [vmem:[#allocation5 + $0x4c] ss:$16 sps:$4 sm:$0xff]  }
  0x88   : > { %1180 = vmatpush2.bf16.msra.mxu1 %v4201_v7  ;;  %1139 = vmatpush2.bf16.msra.mxu0 %v4198_v9  ;;  %v4252_v7 = vld [vmem:[#allocation5 + $0x40] ss:$16 sps:$4 sm:$0xff]   ;;  %v4260_v9 = vld [vmem:[#allocation5 + $0x24] ss:$16 sps:$4 sm:$0xff]  }
  0x89   : > { %1181 = vmatprep.subr.bf16.mxu1 %v4209_v8  ;;  %1140 = vmatprep.subr.bf16.mxu0 %v4206_v10  ;;  %v4255_v8 = vld [vmem:[#allocation5 + $0x48] ss:$16 sps:$4 sm:$0xff]   ;;  %v4263_v10 = vld [vmem:[#allocation5 + $0x2c] ss:$16 sps:$4 sm:$0xff]  }
  0x8c   : > { %1182 = vmatpush2.bf16.msra.mxu1 %v4207_v11  ;;  %1141 = vmatpush2.bf16.msra.mxu0 %v4204_v12  ;;  %v4258_v11 = vld [vmem:[#allocation5 + $0x20] ss:$16 sps:$4 sm:$0xff]   ;;  %v4261_v12 = vld [vmem:[#allocation5 + $0x28] ss:$16 sps:$4 sm:$0xff]  }
  0x8d   : > { %1142 = vmatprep.subr.bf16.mxu0 %v4212_v13  ;;  %1183 = vmatprep.subr.bf16.mxu1 %v4215_v14  ;;  %v4266_v13 = vld [vmem:[#allocation5 + $0x4] ss:$16 sps:$4 sm:$0xff]   ;;  %v4269_v14 = vld [vmem:[#allocation5 + $0xc] ss:$16 sps:$4 sm:$0xff]  }
  0x90   : > { %1143 = vmatpush2.bf16.msra.mxu0 %v4210_v15  ;;  %1184 = vmatpush2.bf16.msra.mxu1 %v4213_v16  ;;  %v4264_v15 = vld [vmem:[#allocation5] ss:$16 sps:$4 sm:$0xff]   ;;  %v4267_v16 = vld [vmem:[#allocation5 + $0x8] ss:$16 sps:$4 sm:$0xff]  }
  0x91   : > { %1144 = vmatprep.subr.bf16.mxu0 %v4218_v17  ;;  %1185 = vmatprep.subr.bf16.mxu1 %v4221_v18  ;;  %v4272_v17 = vld [vmem:[#allocation5 + $0x1e4] ss:$16 sps:$4 sm:$0xff]   ;;  %v4275_v18 = vld [vmem:[#allocation5 + $0x1ec] ss:$16 sps:$4 sm:$0xff]  }
  0x94   : > { %1145 = vmatpush2.bf16.msra.mxu0 %v4216_v19  ;;  %1186 = vmatpush2.bf16.msra.mxu1 %v4219_v21  ;;  %v4270_v19 = vld [vmem:[#allocation5 + $0x1e0] ss:$16 sps:$4 sm:$0xff]   ;;  %v4273_v21 = vld [vmem:[#allocation5 + $0x1e8] ss:$16 sps:$4 sm:$0xff]  }
  0x95   : > { %1516 = vmatprep.subr.bf16.mxu0 %v4224_v22  ;;  %1557 = vmatprep.subr.bf16.mxu1 %v4227_v23  ;;  %v4278_v22 = vld [vmem:[#allocation5 + $0x1c4] ss:$16 sps:$4 sm:$0xff]   ;;  %v4281_v23 = vld [vmem:[#allocation5 + $0x1cc] ss:$16 sps:$4 sm:$0xff]  }
 0x117   : > { %v719_v32 = vpop.f32.mrf.mxu1  ;;  %v4965_v36 = vpop.f32.mrf.mxu0 }
 0x118   : > { %v720_v33 = vadd.f32 %v719_v32, %v658_v29  ;;  %v4284_v29 = vld [vmem:[#allocation5 + $0x1a4] ss:$16 sps:$4 sm:$0xff]   ;;  %v4282_v32 = vld [vmem:[#allocation5 + $0x1a0] ss:$16 sps:$4 sm:$0xff]  }
 0x119   : > { %v721_v35 = vpop.f32.mrf.mxu1  ;;  %v576_v40 = vpop.f32.mrf.mxu0 }
 0x11a   : > { %v722_v37 = vadd.f32 %v721_v35, %v662_v31  ;;  %v726_v38 = vmax.f32 %v720_v33, 0.0  ;;  %v577_v42 = vadd.f32 %v576_v40, %v513_v34  ;;  %v4287_v31 = vld [vmem:[#allocation5 + $0x1ac] ss:$16 sps:$4 sm:$0xff]   ;;  %v4285_v33 = vld [vmem:[#allocation5 + $0x1a8] ss:$16 sps:$4 sm:$0xff]  }
 0x11b   : > { %v723_v39 = vpop.f32.mrf.mxu1  ;;  %v578_v44 = vpop.f32.mrf.mxu0  ;;  %v4290_v34 = vld [vmem:[#allocation5 + $0x184] ss:$16 sps:$4 sm:$0xff]   ;;  %v4293_v35 = vld [vmem:[#allocation5 + $0x18c] ss:$16 sps:$4 sm:$0xff]  }
 0x11c   : > { %v727_v41 = vmax.f32 %v722_v37, 0.0  ;;  %v582_v48 = vmax.f32 %v577_v42, 0.0  ;;  %v728_v49 = vpack.c.bf16 %v726_v38, %v726_v38  ;;  %v4288_v37 = vld [vmem:[#allocation5 + $0x180] ss:$16 sps:$4 sm:$0xff]   ;;  %v4291_v38 = vld [vmem:[#allocation5 + $0x188] ss:$16 sps:$4 sm:$0xff]  }
 0x11d   : > { %v724_v43 = vpop.f32.mrf.mxu1  ;;  %v579_v52 = vpop.f32.mrf.mxu0  ;;  %v4296_v39 = vld [vmem:[#allocation5 + $0x164] ss:$16 sps:$4 sm:$0xff]   ;;  %v4299_v40 = vld [vmem:[#allocation5 + $0x16c] ss:$16 sps:$4 sm:$0xff]   ;;  %v4297_v42 = vld [vmem:[#allocation5 + $0x168] ss:$16 sps:$4 sm:$0xff]  }
 0x11e   : > { %v729_v45 = vpack.c.bf16 %v727_v41, %v727_v41  ;;  %v584_v53 = vpack.c.bf16 %v582_v48, %v582_v48  ;;  %v4294_v41 = vld [vmem:[#allocation5 + $0x160] ss:$16 sps:$4 sm:$0xff]   ;;  %v4302_v43 = vld [vmem:[#allocation5 + $0x144] ss:$16 sps:$4 sm:$0xff]   ;;  %v4305_v44 = vld [vmem:[#allocation5 + $0x14c] ss:$16 sps:$4 sm:$0xff]  }
 0x11f   : > { %v4308_v48 = vld [vmem:[#allocation5 + $0x124] ss:$16 sps:$4 sm:$0xff]  }
 0x120   : > { %1146 = vmatprep.mubr.bf16.mxu0 %v729_v45  ;;  %1187 = vmatprep.mubr.bf16.mxu1 %v729_v45  ;;  %v4300_v45 = vld [vmem:[#allocation5 + $0x140] ss:$16 sps:$4 sm:$0xff]  }
 0x121   : > { %1147 = vmatmul.mubr.bf16.vlgmr.msra.gmra.mxu0 %v728_v49  ;;  %1188 = vmatmul.mubr.bf16.vlgmr.msra.gmra.mxu1 %v728_v49  ;;  %v4311_v49 = vld [vmem:[#allocation5 + $0x12c] ss:$16 sps:$4 sm:$0xff]  }
 0x122   : > { %1517 = vmatpush1.bf16.msra.mxu0 %v4222_v46  ;;  %1558 = vmatpush1.bf16.msra.mxu1 %v4225_v47  ;;  %v4303_v46 = vld [vmem:[#allocation5 + $0x148] ss:$16 sps:$4 sm:$0xff]   ;;  %v509_v47 = vrot.slane %v4960_v30, %v4948_v26 }
 0x123   : > { %1518 = vmatprep.subr.bf16.mxu0 %v4230_v50  ;;  %1559 = vmatprep.subr.bf16.mxu1 %v4233_v51  ;;  %v4306_v50 = vld [vmem:[#allocation5 + $0x120] ss:$16 sps:$4 sm:$0xff]   ;;  %v4309_v51 = vld [vmem:[#allocation5 + $0x128] ss:$16 sps:$4 sm:$0xff]  }
 0x124   : > { %1548 = vmatprep.mubr.bf16.mxu0 %v584_v53  ;;  %1589 = vmatprep.mubr.bf16.mxu1 %v584_v53  ;;  %v575_v52 = vadd.f32 %v4965_v36, %v509_v47  ;;  %v4314_v53 = vld [vmem:[#allocation5 + $0x104] ss:$16 sps:$4 sm:$0xff]   ;;  %v4315_v30 = vld [vmem:[#allocation5 + $0x108] ss:$16 sps:$4 sm:$0xff]  }
 0x125   : > { %v4375_v47 = vld [vmem:[#allocation5 + $0x5c8] ss:$16 sps:$4 sm:$0xff]  }
 0x126   : > { %1519 = vmatpush1.bf16.msra.mxu0 %v4228_v54  ;;  %1560 = vmatpush1.bf16.msra.mxu1 %v4231_v55  ;;  %v4317_v54 = vld [vmem:[#allocation5 + $0x10c] ss:$16 sps:$4 sm:$0xff]   ;;  %v1600_v55 = vld [vmem:[#allocation3 + $0x50] sm:$0xff] }
 0x127   : > { %1520 = vmatprep.subr.bf16.mxu0 %v4236_v56  ;;  %1561 = vmatprep.subr.bf16.mxu1 %v4239_v57  ;;  %v1601_v56 = vld [vmem:[#allocation3 + $0x70] sm:$0xff] }
 0x128   : > { %v4312_v57 = vld [vmem:[#allocation5 + $0x100] ss:$16 sps:$4 sm:$0xff]  }
 0x12a   : > { %1521 = vmatpush1.bf16.msra.mxu0 %v4234_v58  ;;  %1562 = vmatpush1.bf16.msra.mxu1 %v4237_v59  ;;  %v581_v58 = vmax.f32 %v575_v52, 0.0  ;;  %v3785_v59 = vcombine.high %v1600_v55, %v1601_v56  ;;  %v4386_v52 = vld [vmem:[#allocation5 + $0x584] ss:$16 sps:$4 sm:$0xff]  }
 0x12b   : > { %1522 = vmatprep.subr.bf16.mxu0 %v4242_v60  ;;  %1563 = vmatprep.subr.bf16.mxu1 %v4245_v61  ;;  %v1598_v60 = vld [vmem:[#allocation3 + $0x10] sm:$0xff] }
 0x12c   : > { %v1599_v61 = vld [vmem:[#allocation3 + $0x30] sm:$0xff]  ;;  %v583_v36 = vpack.c.bf16 %v581_v58, %v581_v58  ;;  %v4393_v58 = vld [vmem:[#allocation5 + $0x568] ss:$16 sps:$4 sm:$0xff]  }
 0x12e   : > { %1523 = vmatpush1.bf16.msra.mxu0 %v4240_v62  ;;  %1564 = vmatpush1.bf16.msra.mxu1 %v4243_v63  ;;  %v3784_v62 = vcombine.low %v1600_v55, %v1601_v56  ;;  %v3783_v63 = vcombine.high %v1598_v60, %v1599_v61  ;;  %v4387_v55 = vld [vmem:[#allocation5 + $0x588] ss:$16 sps:$4 sm:$0xff]   ;;  %v4392_v56 = vld [vmem:[#allocation5 + $0x564] ss:$16 sps:$4 sm:$0xff]  }
 0x12f   : > { %1524 = vmatprep.subr.bf16.mxu0 %v4248_v0  ;;  %1565 = vmatprep.subr.bf16.mxu1 %v4251_v2  ;;  %v3782_v0 = vcombine.low %v1598_v60, %v1599_v61  ;;  %v4318_v2 = vld [vmem:[#allocation5 + $0x4e0] ss:$16 sps:$4 sm:$0xff]   ;;  %v4401_v60 = vld [vmem:[#allocation5 + $0x54c] ss:$16 sps:$4 sm:$0xff]  }
 0x130   : > { %v4396_v61 = vld [vmem:[#allocation5 + $0x540] ss:$16 sps:$4 sm:$0xff]  }
 0x132   : > { %1525 = vmatpush1.bf16.msra.mxu0 %v4246_v3  ;;  %1566 = vmatpush1.bf16.msra.mxu1 %v4249_v4  ;;  %v4320_v3 = vld [vmem:[#allocation5 + $0x4e4] ss:$16 sps:$4 sm:$0xff]   ;;  %v4321_v4 = vld [vmem:[#allocation5 + $0x4e8] ss:$16 sps:$4 sm:$0xff]  }
 0x133   : > { %1526 = vmatprep.subr.bf16.mxu0 %v4254_v5  ;;  %1567 = vmatprep.subr.bf16.mxu1 %v4257_v6  ;;  %v4323_v5 = vld [vmem:[#allocation5 + $0x4ec] ss:$16 sps:$4 sm:$0xff]   ;;  %v4326_v6 = vld [vmem:[#allocation5 + $0x4c4] ss:$16 sps:$4 sm:$0xff]  }
 0x136   : > { %1527 = vmatpush1.bf16.msra.mxu0 %v4252_v7  ;;  %1568 = vmatpush1.bf16.msra.mxu1 %v4255_v8  ;;  %v4329_v7 = vld [vmem:[#allocation5 + $0x4cc] ss:$16 sps:$4 sm:$0xff]   ;;  %v4324_v8 = vld [vmem:[#allocation5 + $0x4c0] ss:$16 sps:$4 sm:$0xff]  }
 0x137   : > { %1528 = vmatprep.subr.bf16.mxu0 %v4260_v9  ;;  %1569 = vmatprep.subr.bf16.mxu1 %v4263_v10  ;;  %v4327_v9 = vld [vmem:[#allocation5 + $0x4c8] ss:$16 sps:$4 sm:$0xff]   ;;  %v4332_v10 = vld [vmem:[#allocation5 + $0x4a4] ss:$16 sps:$4 sm:$0xff]  }
 0x13a   : > { %1529 = vmatpush1.bf16.msra.mxu0 %v4258_v11  ;;  %1570 = vmatpush1.bf16.msra.mxu1 %v4261_v12  ;;  %v4335_v11 = vld [vmem:[#allocation5 + $0x4ac] ss:$16 sps:$4 sm:$0xff]   ;;  %v4330_v12 = vld [vmem:[#allocation5 + $0x4a0] ss:$16 sps:$4 sm:$0xff]  }
 0x13b   : > { %1530 = vmatprep.subr.bf16.mxu0 %v4266_v13  ;;  %1571 = vmatprep.subr.bf16.mxu1 %v4269_v14  ;;  %v4333_v13 = vld [vmem:[#allocation5 + $0x4a8] ss:$16 sps:$4 sm:$0xff]   ;;  %v4338_v14 = vld [vmem:[#allocation5 + $0x484] ss:$16 sps:$4 sm:$0xff]  }
 0x13e   : > { %1531 = vmatpush1.bf16.msra.mxu0 %v4264_v15  ;;  %1572 = vmatpush1.bf16.msra.mxu1 %v4267_v16  ;;  %v4341_v15 = vld [vmem:[#allocation5 + $0x48c] ss:$16 sps:$4 sm:$0xff]   ;;  %v4336_v16 = vld [vmem:[#allocation5 + $0x480] ss:$16 sps:$4 sm:$0xff]  }
 0x13f   : > { %1532 = vmatprep.subr.bf16.mxu0 %v4272_v17  ;;  %1573 = vmatprep.subr.bf16.mxu1 %v4275_v18  ;;  %v4339_v17 = vld [vmem:[#allocation5 + $0x488] ss:$16 sps:$4 sm:$0xff]   ;;  %v4344_v18 = vld [vmem:[#allocation5 + $0x464] ss:$16 sps:$4 sm:$0xff]  }
 0x142   : > { %1533 = vmatpush2.bf16.msra.mxu0 %v4270_v19  ;;  %1574 = vmatpush2.bf16.msra.mxu1 %v4273_v21  ;;  %v4347_v19 = vld [vmem:[#allocation5 + $0x46c] ss:$16 sps:$4 sm:$0xff]   ;;  %v4342_v21 = vld [vmem:[#allocation5 + $0x460] ss:$16 sps:$4 sm:$0xff]  }
 0x143   : > { %1534 = vmatprep.subr.bf16.mxu0 %v4278_v22  ;;  %1575 = vmatprep.subr.bf16.mxu1 %v4281_v23  ;;  %v4345_v22 = vld [vmem:[#allocation5 + $0x468] ss:$16 sps:$4 sm:$0xff]   ;;  %v4350_v23 = vld [vmem:[#allocation5 + $0x444] ss:$16 sps:$4 sm:$0xff]  }
 0x146   : > { %1535 = vmatpush2.bf16.msra.mxu0 %v4276_v24  ;;  %1576 = vmatpush2.bf16.msra.mxu1 %v4279_v27  ;;  %v4353_v24 = vld [vmem:[#allocation5 + $0x44c] ss:$16 sps:$4 sm:$0xff]   ;;  %v4348_v27 = vld [vmem:[#allocation5 + $0x440] ss:$16 sps:$4 sm:$0xff]  }
 0x147   : > { %1536 = vmatprep.subr.bf16.mxu0 %v4284_v29  ;;  %1577 = vmatprep.subr.bf16.mxu1 %v4287_v31  ;;  %v4351_v29 = vld [vmem:[#allocation5 + $0x448] ss:$16 sps:$4 sm:$0xff]   ;;  %v4356_v31 = vld [vmem:[#allocation5 + $0x424] ss:$16 sps:$4 sm:$0xff]  }
 0x14a   : > { %1537 = vmatpush2.bf16.msra.mxu0 %v4282_v32  ;;  %1578 = vmatpush2.bf16.msra.mxu1 %v4285_v33  ;;  %v4359_v32 = vld [vmem:[#allocation5 + $0x42c] ss:$16 sps:$4 sm:$0xff]   ;;  %v4354_v33 = vld [vmem:[#allocation5 + $0x420] ss:$16 sps:$4 sm:$0xff]  }
 0x14b   : > { %1538 = vmatprep.subr.bf16.mxu0 %v4290_v34  ;;  %1579 = vmatprep.subr.bf16.mxu1 %v4293_v35  ;;  %v4357_v34 = vld [vmem:[#allocation5 + $0x428] ss:$16 sps:$4 sm:$0xff]   ;;  %v4362_v35 = vld [vmem:[#allocation5 + $0x404] ss:$16 sps:$4 sm:$0xff]  }
 0x14e   : > { %1539 = vmatpush2.bf16.msra.mxu0 %v4288_v37  ;;  %1580 = vmatpush2.bf16.msra.mxu1 %v4291_v38  ;;  %v4365_v37 = vld [vmem:[#allocation5 + $0x40c] ss:$16 sps:$4 sm:$0xff]   ;;  %v4360_v38 = vld [vmem:[#allocation5 + $0x400] ss:$16 sps:$4 sm:$0xff]  }
 0x14f   : > { %1540 = vmatprep.subr.bf16.mxu0 %v4296_v39  ;;  %1581 = vmatprep.subr.bf16.mxu1 %v4299_v40  ;;  %v4363_v39 = vld [vmem:[#allocation5 + $0x408] ss:$16 sps:$4 sm:$0xff]   ;;  %v4368_v40 = vld [vmem:[#allocation5 + $0x5e4] ss:$16 sps:$4 sm:$0xff]  }
 0x152   : > { %1541 = vmatpush2.bf16.msra.mxu0 %v4294_v41  ;;  %1582 = vmatpush2.bf16.msra.mxu1 %v4297_v42  ;;  %v4371_v41 = vld [vmem:[#allocation5 + $0x5ec] ss:$16 sps:$4 sm:$0xff]   ;;  %v4366_v42 = vld [vmem:[#allocation5 + $0x5e0] ss:$16 sps:$4 sm:$0xff]  }
 0x153   : > { %1542 = vmatprep.subr.bf16.mxu0 %v4302_v43  ;;  %1583 = vmatprep.subr.bf16.mxu1 %v4305_v44  ;;  %v4369_v43 = vld [vmem:[#allocation5 + $0x5e8] ss:$16 sps:$4 sm:$0xff]   ;;  %v4374_v44 = vld [vmem:[#allocation5 + $0x5c4] ss:$16 sps:$4 sm:$0xff]  }
 0x156   : > { %1543 = vmatpush2.bf16.msra.mxu0 %v4300_v45  ;;  %1584 = vmatpush2.bf16.msra.mxu1 %v4303_v46  ;;  %v4377_v45 = vld [vmem:[#allocation5 + $0x5cc] ss:$16 sps:$4 sm:$0xff]   ;;  %v4372_v46 = vld [vmem:[#allocation5 + $0x5c0] ss:$16 sps:$4 sm:$0xff]  }
 0x157   : > { %1544 = vmatprep.subr.bf16.mxu0 %v4308_v48  ;;  %1585 = vmatprep.subr.bf16.mxu1 %v4311_v49  ;;  %v4380_v48 = vld [vmem:[#allocation5 + $0x5a4] ss:$16 sps:$4 sm:$0xff]   ;;  %v4383_v49 = vld [vmem:[#allocation5 + $0x5ac] ss:$16 sps:$4 sm:$0xff]  }
 0x15a   : > { %1545 = vmatpush2.bf16.msra.mxu0 %v4306_v50  ;;  %1586 = vmatpush2.bf16.msra.mxu1 %v4309_v51  ;;  %v4378_v50 = vld [vmem:[#allocation5 + $0x5a0] ss:$16 sps:$4 sm:$0xff]   ;;  %v4381_v51 = vld [vmem:[#allocation5 + $0x5a8] ss:$16 sps:$4 sm:$0xff]  }
 0x15b   : > { %1546 = vmatprep.subr.bf16.mxu0 %v4314_v53  ;;  %1587 = vmatprep.subr.bf16.mxu1 %v4317_v54  ;;  %v4389_v53 = vld [vmem:[#allocation5 + $0x58c] ss:$16 sps:$4 sm:$0xff]   ;;  %v4384_v54 = vld [vmem:[#allocation5 + $0x580] ss:$16 sps:$4 sm:$0xff]  }
 0x15e   : > { %1547 = vmatpush2.bf16.msra.mxu0 %v4312_v57  ;;  %1588 = vmatpush2.bf16.msra.mxu1 %v4315_v30  ;;  %v4395_v57 = vld [vmem:[#allocation5 + $0x56c] ss:$16 sps:$4 sm:$0xff]   ;;  %v4390_v30 = vld [vmem:[#allocation5 + $0x560] ss:$16 sps:$4 sm:$0xff]  }
 0x15f   : > { %1646 = vmatprep.subr.bf16.mxu0 %v3785_v59  ;;  %2063 = vmatprep.subr.bf16.mxu1 %v4320_v3  ;;  %v4398_v59 = vld [vmem:[#allocation5 + $0x544] ss:$16 sps:$4 sm:$0xff]  }
 0x160   : > { %v4410_v3 = vld [vmem:[#allocation5 + $0x504] ss:$16 sps:$4 sm:$0xff]  }
 0x161   : > { %1549 = vmatmul.mubr.bf16.vlgmr.msra.gmra.mxu0 %v583_v36  ;;  %1590 = vmatmul.mubr.bf16.vlgmr.msra.gmra.mxu1 %v583_v36  ;;  %v4404_v36 = vld [vmem:[#allocation5 + $0x524] ss:$16 sps:$4 sm:$0xff]  }
 0x162   : > { %1647 = vmatpush1.bf16.msra.mxu0 %v3784_v62  ;;  %1666 = vmatprep.mubr.bf16.mxu0 %v4770_v1  ;;  %v4399_v62 = vld [vmem:[#allocation5 + $0x548] ss:$16 sps:$4 sm:$0xff]  }
 0x163   : > { %1648 = vmatprep.subr.bf16.mxu0 %v3783_v63  ;;  %2064 = vmatpush1.bf16.msra.mxu1 %v4318_v2  ;;  %v4407_v63 = vld [vmem:[#allocation5 + $0x52c] ss:$16 sps:$4 sm:$0xff]   ;;  %v4405_v2 = vld [vmem:[#allocation5 + $0x528] ss:$16 sps:$4 sm:$0xff]  }
 0x164   : > { %2065 = vmatprep.subr.bf16.mxu1 %v4326_v6  ;;  %v4411_v6 = vld [vmem:[#allocation5 + $0x508] ss:$16 sps:$4 sm:$0xff]  }
 0x166   : > { %1649 = vmatpush1.bf16.msra.mxu0 %v3782_v0  ;;  %v4402_v0 = vld [vmem:[#allocation5 + $0x520] ss:$16 sps:$4 sm:$0xff]  }
 0x167   : > { %2104 = vmatprep.subr.bf16.mxu0 %v4323_v5  ;;  %2066 = vmatpush1.bf16.msra.mxu1 %v4324_v8  ;;  %v4408_v5 = vld [vmem:[#allocation5 + $0x500] ss:$16 sps:$4 sm:$0xff]   ;;  %v2152_v8 = vld [vmem:[#allocation3 + $0x78] sm:$0xff] }
 0x168   : > { %2067 = vmatprep.subr.bf16.mxu1 %v4332_v10 }
 0x169   : > { %3786 = vmatmul.mubr.msk.bf16.vlgmr.msra.gmra.mxu0 %vm536_vm0, %v4939_v20 }
 0x16a   : > { %2105 = vmatpush1.bf16.msra.mxu0 %v4321_v4  ;;  %v4413_v4 = vld [vmem:[#allocation5 + $0x50c] ss:$16 sps:$4 sm:$0xff]  }
 0x16b   : > { %2106 = vmatprep.subr.bf16.mxu0 %v4329_v7  ;;  %2068 = vmatpush1.bf16.msra.mxu1 %v4330_v12  ;;  %v2151_v7 = vld [vmem:[#allocation3 + $0x58] sm:$0xff] }
 0x16c   : > { %2069 = vmatprep.subr.bf16.mxu1 %v4338_v14  ;;  %v3853_v10 = vcombine.low %v2151_v7, %v2152_v8 }
 0x16e   : > { %2107 = vmatpush1.bf16.msra.mxu0 %v4327_v9  ;;  %v3854_v9 = vcombine.high %v2151_v7, %v2152_v8  ;;  %v4444_v7 = vld [vmem:[#allocation5 + $0x640] ss:$16 sps:$4 sm:$0xff]   ;;  %v4452_v8 = vld [vmem:[#allocation5 + $0x624] ss:$16 sps:$4 sm:$0xff]  }
 0x16f   : > { %2108 = vmatprep.subr.bf16.mxu0 %v4335_v11  ;;  %2070 = vmatpush1.bf16.msra.mxu1 %v4336_v16  ;;  %v4416_v11 = vld [vmem:[#allocation5 + $0x6e4] ss:$16 sps:$4 sm:$0xff]  }
 0x170   : > { %2071 = vmatprep.subr.bf16.mxu1 %v4344_v18 }
 0x172   : > { %2109 = vmatpush1.bf16.msra.mxu0 %v4333_v13 }
 0x173   : > { %2110 = vmatprep.subr.bf16.mxu0 %v4341_v15  ;;  %2072 = vmatpush1.bf16.msra.mxu1 %v4342_v21 }
 0x174   : > { %2073 = vmatprep.subr.bf16.mxu1 %v4350_v23 }
 0x176   : > { %2111 = vmatpush1.bf16.msra.mxu0 %v4339_v17 }
 0x177   : > { %2112 = vmatprep.subr.bf16.mxu0 %v4347_v19  ;;  %2074 = vmatpush1.bf16.msra.mxu1 %v4348_v27 }
 0x178   : > { %2075 = vmatprep.subr.bf16.mxu1 %v4356_v31  ;;  %v1602_v31 = vld [vmem:[%s5065_s2 + $0x4] sm:$0x3] }
 0x17a   : > { %2113 = vmatpush1.bf16.msra.mxu0 %v4345_v22 }
 0x17b   : > { %2114 = vmatprep.subr.bf16.mxu0 %v4353_v24  ;;  %2076 = vmatpush1.bf16.msra.mxu1 %v4354_v33 }
 0x17c   : > { %2077 = vmatprep.subr.bf16.mxu1 %v4362_v35 }
 0x17e   : > { %2115 = vmatpush1.bf16.msra.mxu0 %v4351_v29 }
 0x17f   : > { %2116 = vmatprep.subr.bf16.mxu0 %v4359_v32  ;;  %2078 = vmatpush1.bf16.msra.mxu1 %v4360_v38 }
 0x180   : > { %2079 = vmatprep.subr.bf16.mxu1 %v4368_v40  ;;  %v1611_v40 = vrot.slane %v1602_v31, %v4954_v28 }
 0x182   : > { %2117 = vmatpush1.bf16.msra.mxu0 %v4357_v34 }
 0x183   : > { %2118 = vmatprep.subr.bf16.mxu0 %v4365_v37  ;;  %2080 = vmatpush2.bf16.msra.mxu1 %v4366_v42  ;;  %v1607_v37 = vrot.slane %v1602_v31, %v4948_v26  ;;  %v4476_v31 = vld [vmem:[#allocation5 + $0x7a4] ss:$16 sps:$4 sm:$0xff]  }
 0x184   : > { %2081 = vmatprep.subr.bf16.mxu1 %v4374_v44 }
 0x186   : > { %2119 = vmatpush1.bf16.msra.mxu0 %v4363_v39 }
 0x187   : > { %2120 = vmatprep.subr.bf16.mxu0 %v4371_v41  ;;  %2082 = vmatpush2.bf16.msra.mxu1 %v4372_v46 }
 0x188   : > { %2083 = vmatprep.subr.bf16.mxu1 %v4380_v48  ;;  %v2149_v48 = vld [vmem:[#allocation3 + $0x18] sm:$0xff] }
 0x18a   : > { %2121 = vmatpush2.bf16.msra.mxu0 %v4369_v43 }
 0x18b   : > { %2122 = vmatprep.subr.bf16.mxu0 %v4377_v45  ;;  %2084 = vmatpush2.bf16.msra.mxu1 %v4378_v50 }
 0x18c   : > { %2085 = vmatprep.subr.bf16.mxu1 %v4386_v52 }
 0x18e   : > { %2123 = vmatpush2.bf16.msra.mxu0 %v4375_v47 }
 0x18f   : > { %2124 = vmatprep.subr.bf16.mxu0 %v4383_v49  ;;  %2086 = vmatpush2.bf16.msra.mxu1 %v4384_v54  ;;  %v2150_v49 = vld [vmem:[#allocation3 + $0x38] sm:$0xff]  ;;  %v4414_v54 = vld [vmem:[#allocation5 + $0x6e0] ss:$16 sps:$4 sm:$0xff]  }
 0x190   : > { %2087 = vmatprep.subr.bf16.mxu1 %v4392_v56  ;;  %v3851_v56 = vcombine.low %v2149_v48, %v2150_v49 }
 0x192   : > { %2125 = vmatpush2.bf16.msra.mxu0 %v4381_v51 }
 0x193   : > { %2126 = vmatprep.subr.bf16.mxu0 %v4389_v53  ;;  %2088 = vmatpush2.bf16.msra.mxu1 %v4390_v30  ;;  %v3852_v53 = vcombine.high %v2149_v48, %v2150_v49  ;;  %v4420_v30 = vld [vmem:[#allocation5 + $0x6c0] ss:$16 sps:$4 sm:$0xff]   ;;  %v4489_v48 = vld [vmem:[#allocation5 + $0x768] ss:$16 sps:$4 sm:$0xff]   ;;  %v4494_v49 = vld [vmem:[#allocation5 + $0x744] ss:$16 sps:$4 sm:$0xff]  }
 0x194   : > { %2089 = vmatprep.subr.bf16.mxu1 %v4398_v59  ;;  %v4417_v59 = vld [vmem:[#allocation5 + $0x6e8] ss:$16 sps:$4 sm:$0xff]  }
 0x196   : > { %2127 = vmatpush2.bf16.msra.mxu0 %v4387_v55  ;;  %v4422_v55 = vld [vmem:[#allocation5 + $0x6c4] ss:$16 sps:$4 sm:$0xff]  }
 0x197   : > { %2128 = vmatprep.subr.bf16.mxu0 %v4395_v57  ;;  %2090 = vmatpush2.bf16.msra.mxu1 %v4396_v61  ;;  %v4419_v57 = vld [vmem:[#allocation5 + $0x6ec] ss:$16 sps:$4 sm:$0xff]   ;;  %v4426_v61 = vld [vmem:[#allocation5 + $0x6a0] ss:$16 sps:$4 sm:$0xff]  }
 0x198   : > { %2091 = vmatprep.subr.bf16.mxu1 %v4404_v36  ;;  %v4423_v36 = vld [vmem:[#allocation5 + $0x6c8] ss:$16 sps:$4 sm:$0xff]  }
 0x19a   : > { %2129 = vmatpush2.bf16.msra.mxu0 %v4393_v58  ;;  %v4428_v58 = vld [vmem:[#allocation5 + $0x6a4] ss:$16 sps:$4 sm:$0xff]  }
 0x19b   : > { %2130 = vmatprep.subr.bf16.mxu0 %v4401_v60  ;;  %2092 = vmatpush2.bf16.msra.mxu1 %v4402_v0  ;;  %v4425_v60 = vld [vmem:[#allocation5 + $0x6cc] ss:$16 sps:$4 sm:$0xff]   ;;  %v4440_v0 = vld [vmem:[#allocation5 + $0x664] ss:$16 sps:$4 sm:$0xff]  }
 0x19c   : > { %2093 = vmatprep.subr.bf16.mxu1 %v4410_v3  ;;  %v4437_v3 = vld [vmem:[#allocation5 + $0x68c] ss:$16 sps:$4 sm:$0xff]  }
 0x19e   : > { %2131 = vmatpush2.bf16.msra.mxu0 %v4399_v62  ;;  %v4434_v62 = vld [vmem:[#allocation5 + $0x684] ss:$16 sps:$4 sm:$0xff]  }
 0x19f   : > { %2132 = vmatprep.subr.bf16.mxu0 %v4407_v63  ;;  %2094 = vmatpush2.bf16.msra.mxu1 %v4408_v5  ;;  %v4432_v63 = vld [vmem:[#allocation5 + $0x680] ss:$16 sps:$4 sm:$0xff]   ;;  %v4446_v5 = vld [vmem:[#allocation5 + $0x644] ss:$16 sps:$4 sm:$0xff]  }
 0x1a0   : > { %2197 = vmatprep.subr.bf16.mxu1 %v3854_v9  ;;  %v4441_v9 = vld [vmem:[#allocation5 + $0x668] ss:$16 sps:$4 sm:$0xff]  }
 0x1a2   : > { %2133 = vmatpush2.bf16.msra.mxu0 %v4405_v2  ;;  %v4429_v2 = vld [vmem:[#allocation5 + $0x6a8] ss:$16 sps:$4 sm:$0xff]  }
 0x1a3   : > { %2134 = vmatprep.subr.bf16.mxu0 %v4413_v4  ;;  %v4438_v4 = vld [vmem:[#allocation5 + $0x660] ss:$16 sps:$4 sm:$0xff]  }
 0x1a6   : > { %2135 = vmatpush2.bf16.msra.mxu0 %v4411_v6  ;;  %v4435_v6 = vld [vmem:[#allocation5 + $0x688] ss:$16 sps:$4 sm:$0xff]  }
 0x1a7   : > { %2614 = vmatprep.subr.bf16.mxu0 %v4416_v11  ;;  %v4450_v11 = vld [vmem:[#allocation5 + $0x620] ss:$16 sps:$4 sm:$0xff]  }
 0x1e1   : > { %v1148_v12 = vpop.f32.mrf.mxu0  ;;  %v1189_v13 = vpop.f32.mrf.mxu1 }
 0x1e3   : > { %v1150_v14 = vpop.f32.mrf.mxu0  ;;  %v1191_v15 = vpop.f32.mrf.mxu1 }
 0x1e5   : > { %v1152_v16 = vpop.f32.mrf.mxu0  ;;  %v1193_v17 = vpop.f32.mrf.mxu1 }
 0x1e6   : > { %v4464_v16 = vld [vmem:[#allocation5 + $0x7e4] ss:$16 sps:$4 sm:$0xff]   ;;  %v4453_v17 = vld [vmem:[#allocation5 + $0x628] ss:$16 sps:$4 sm:$0xff]  }
 0x1e7   : > { %v1153_v18 = vpop.f32.mrf.mxu0  ;;  %v1194_v19 = vpop.f32.mrf.mxu1 }
 0x1e8   : > { %v4461_v18 = vld [vmem:[#allocation5 + $0x60c] ss:$16 sps:$4 sm:$0xff]   ;;  %v4462_v19 = vld [vmem:[#allocation5 + $0x7e0] ss:$16 sps:$4 sm:$0xff]  }
 0x221   : > { %v1550_v21 = vpop.f32.mrf.mxu0  ;;  %v1591_v22 = vpop.f32.mrf.mxu1 }
 0x222   : > { %v4973_v23 = vadd.f32 %v1550_v21, %v1148_v12  ;;  %v4975_v24 = vadd.f32 %v1591_v22, %v1189_v13  ;;  %v4458_v12 = vld [vmem:[#allocation5 + $0x604] ss:$16 sps:$4 sm:$0xff]   ;;  %v4447_v13 = vld [vmem:[#allocation5 + $0x648] ss:$16 sps:$4 sm:$0xff]  }
 0x223   : > { %v1552_v27 = vpop.f32.mrf.mxu0  ;;  %v1593_v29 = vpop.f32.mrf.mxu1  ;;  %v4470_v21 = vld [vmem:[#allocation5 + $0x7c4] ss:$16 sps:$4 sm:$0xff]   ;;  %v4459_v22 = vld [vmem:[#allocation5 + $0x608] ss:$16 sps:$4 sm:$0xff]  }
 0x224   : > { %v4980_v32 = vadd.f32 %v1552_v27, %v1150_v14  ;;  %v4982_v33 = vadd.f32 %v1593_v29, %v1191_v15  ;;  %v4455_v14 = vld [vmem:[#allocation5 + $0x62c] ss:$16 sps:$4 sm:$0xff]   ;;  %v4456_v15 = vld [vmem:[#allocation5 + $0x600] ss:$16 sps:$4 sm:$0xff]  }
 0x225   : > { %v1554_v34 = vpop.f32.mrf.mxu0  ;;  %v1595_v35 = vpop.f32.mrf.mxu1  ;;  %v4467_v27 = vld [vmem:[#allocation5 + $0x7ec] ss:$16 sps:$4 sm:$0xff]   ;;  %v4468_v29 = vld [vmem:[#allocation5 + $0x7c0] ss:$16 sps:$4 sm:$0xff]  }
 0x226   : > { %v4465_v34 = vld [vmem:[#allocation5 + $0x7e8] ss:$16 sps:$4 sm:$0xff]   ;;  %v4473_v35 = vld [vmem:[#allocation5 + $0x7cc] ss:$16 sps:$4 sm:$0xff]  }
 0x227   : > { %v1555_v38 = vpop.f32.mrf.mxu0  ;;  %v1596_v39 = vpop.f32.mrf.mxu1 }
 0x228   : > { %v4482_v38 = vld [vmem:[#allocation5 + $0x784] ss:$16 sps:$4 sm:$0xff]   ;;  %v4471_v39 = vld [vmem:[#allocation5 + $0x7c8] ss:$16 sps:$4 sm:$0xff]  }
 0x229   : > { %v1668_v41 = vpop.f32.mrf.mxu0 }
 0x22a   : > { %v1669_v42 = vadd.f32 %v1668_v41, %v1607_v37  ;;  %v4474_v37 = vld [vmem:[#allocation5 + $0x7a0] ss:$16 sps:$4 sm:$0xff]  }
 0x22b   : > { %v1670_v43 = vpop.f32.mrf.mxu0  ;;  %v4480_v41 = vld [vmem:[#allocation5 + $0x780] ss:$16 sps:$4 sm:$0xff]  }
 0x22c   : > { %v1671_v44 = vadd.f32 %v1670_v43, %v1611_v40  ;;  %v1675_v45 = vmax.f32 %v1669_v42, 0.0  ;;  %v4479_v40 = vld [vmem:[#allocation5 + $0x7ac] ss:$16 sps:$4 sm:$0xff]   ;;  %v4477_v42 = vld [vmem:[#allocation5 + $0x7a8] ss:$16 sps:$4 sm:$0xff]  }
 0x22d   : > { %v1672_v46 = vpop.f32.mrf.mxu0  ;;  %v4485_v43 = vld [vmem:[#allocation5 + $0x78c] ss:$16 sps:$4 sm:$0xff]  }
 0x22e   : > { %v1676_v47 = vmax.f32 %v1671_v44, 0.0  ;;  %v1677_v52 = vpack.c.bf16 %v1675_v45, %v1675_v45  ;;  %v4483_v44 = vld [vmem:[#allocation5 + $0x788] ss:$16 sps:$4 sm:$0xff]   ;;  %v4488_v45 = vld [vmem:[#allocation5 + $0x764] ss:$16 sps:$4 sm:$0xff]  }
 0x22f   : > { %v1673_v50 = vpop.f32.mrf.mxu0  ;;  %v4491_v46 = vld [vmem:[#allocation5 + $0x76c] ss:$16 sps:$4 sm:$0xff]  }
 0x230   : > { %v1678_v51 = vpack.c.bf16 %v1676_v47, %v1676_v47  ;;  %v4486_v47 = vld [vmem:[#allocation5 + $0x760] ss:$16 sps:$4 sm:$0xff]   ;;  %v4497_v50 = vld [vmem:[#allocation5 + $0x74c] ss:$16 sps:$4 sm:$0xff]  }
 0x232   : > { %2095 = vmatprep.mubr.bf16.mxu1 %v1678_v51  ;;  %2136 = vmatprep.mubr.bf16.mxu0 %v1678_v51  ;;  %v4492_v51 = vld [vmem:[#allocation5 + $0x740] ss:$16 sps:$4 sm:$0xff]  }
 0x233   : > { %2096 = vmatmul.mubr.bf16.vlgmr.msra.gmra.mxu1 %v1677_v52  ;;  %2137 = vmatmul.mubr.bf16.vlgmr.msra.gmra.mxu0 %v1677_v52  ;;  %v4495_v52 = vld [vmem:[#allocation5 + $0x748] ss:$16 sps:$4 sm:$0xff]  }
 0x234   : > { %2198 = vmatpush1.bf16.msra.mxu1 %v3853_v10  ;;  %2217 = vmatprep.mubr.bf16.mxu1 %v4770_v1  ;;  %v4431_v1 = vld [vmem:[#allocation5 + $0x6ac] ss:$16 sps:$4 sm:$0xff]  }
 0x235   : > { %2199 = vmatprep.subr.bf16.mxu1 %v3852_v53  ;;  %2615 = vmatpush1.bf16.msra.mxu0 %v4414_v54  ;;  %v4449_v10 = vld [vmem:[#allocation5 + $0x64c] ss:$16 sps:$4 sm:$0xff]   ;;  %v4500_v53 = vld [vmem:[#allocation5 + $0x724] ss:$16 sps:$4 sm:$0xff]  }
 0x236   : > { %2616 = vmatprep.subr.bf16.mxu0 %v4422_v55  ;;  %v4503_v54 = vld [vmem:[#allocation5 + $0x72c] ss:$16 sps:$4 sm:$0xff]   ;;  %v4498_v55 = vld [vmem:[#allocation5 + $0x720] ss:$16 sps:$4 sm:$0xff]  }
 0x238   : > { %2200 = vmatpush1.bf16.msra.mxu1 %v3851_v56  ;;  %v4501_v56 = vld [vmem:[#allocation5 + $0x728] ss:$16 sps:$4 sm:$0xff]  }
 0x239   : > { %2655 = vmatprep.subr.bf16.mxu1 %v4419_v57  ;;  %2617 = vmatpush1.bf16.msra.mxu0 %v4420_v30  ;;  %v4506_v57 = vld [vmem:[#allocation5 + $0x704] ss:$16 sps:$4 sm:$0xff]   ;;  %v4509_v30 = vld [vmem:[#allocation5 + $0x70c] ss:$16 sps:$4 sm:$0xff]  }
 0x23a   : > { %2618 = vmatprep.subr.bf16.mxu0 %v4428_v58  ;;  %v4504_v58 = vld [vmem:[#allocation5 + $0x700] ss:$16 sps:$4 sm:$0xff]  }
 0x23b   : > { %3855 = vmatmul.mubr.msk.bf16.vlgmr.msra.gmra.mxu1 %vm536_vm0, %v4939_v20  ;;  %v4443_v20 = vld [vmem:[#allocation5 + $0x66c] ss:$16 sps:$4 sm:$0xff]  }
 0x23c   : > { %2656 = vmatpush1.bf16.msra.mxu1 %v4417_v59  ;;  %v4507_v59 = vld [vmem:[#allocation5 + $0x708] ss:$16 sps:$4 sm:$0xff]  }
 0x23d   : > { %2657 = vmatprep.subr.bf16.mxu1 %v4425_v60  ;;  %2619 = vmatpush1.bf16.msra.mxu0 %v4426_v61  ;;  %v4512_v60 = vld [vmem:[#allocation7 + $0x74] ss:$8 sps:$4 sm:$0xff]  }
 0x23e   : > { %2620 = vmatprep.subr.bf16.mxu0 %v4434_v62  ;;  %v4515_v61 = vld [vmem:[#allocation7 + $0x174] ss:$8 sps:$4 sm:$0xff]  }
 0x240   : > { %2658 = vmatpush1.bf16.msra.mxu1 %v4423_v36 }
 0x241   : > { %2659 = vmatprep.subr.bf16.mxu1 %v4431_v1  ;;  %2621 = vmatpush1.bf16.msra.mxu0 %v4432_v63 }
 0x242   : > { %2622 = vmatprep.subr.bf16.mxu0 %v4440_v0 }
 0x244   : > { %2660 = vmatpush1.bf16.msra.mxu1 %v4429_v2 }
 0x245   : > { %2661 = vmatprep.subr.bf16.mxu1 %v4437_v3  ;;  %2623 = vmatpush1.bf16.msra.mxu0 %v4438_v4  ;;  %v2153_v3 = vld [vmem:[%s5065_s2 + $0x6] sm:$0x3] }
 0x246   : > { %2624 = vmatprep.subr.bf16.mxu0 %v4446_v5 }
 0x248   : > { %2662 = vmatpush1.bf16.msra.mxu1 %v4435_v6 }
 0x249   : > { %2663 = vmatprep.subr.bf16.mxu1 %v4443_v20  ;;  %2625 = vmatpush1.bf16.msra.mxu0 %v4444_v7 }
 0x24a   : > { %2626 = vmatprep.subr.bf16.mxu0 %v4452_v8 }
 0x24c   : > { %2664 = vmatpush1.bf16.msra.mxu1 %v4441_v9 }
 0x24d   : > { %2665 = vmatprep.subr.bf16.mxu1 %v4449_v10  ;;  %2627 = vmatpush1.bf16.msra.mxu0 %v4450_v11 }
 0x24e   : > { %2628 = vmatprep.subr.bf16.mxu0 %v4458_v12 }
 0x250   : > { %2666 = vmatpush1.bf16.msra.mxu1 %v4447_v13 }
 0x251   : > { %2667 = vmatprep.subr.bf16.mxu1 %v4455_v14  ;;  %2629 = vmatpush1.bf16.msra.mxu0 %v4456_v15 }
 0x252   : > { %2630 = vmatprep.subr.bf16.mxu0 %v4464_v16 }
 0x254   : > { %2668 = vmatpush1.bf16.msra.mxu1 %v4453_v17  ;;  %v4510_v17 = vld [vmem:[#allocation7 + $0x70] ss:$8 sps:$4 sm:$0xff]  }
 0x255   : > { %2669 = vmatprep.subr.bf16.mxu1 %v4461_v18  ;;  %2631 = vmatpush2.bf16.msra.mxu0 %v4462_v19  ;;  %v4518_v19 = vld [vmem:[#allocation7 + $0x64] ss:$8 sps:$4 sm:$0xff]  }
 0x256   : > { %2632 = vmatprep.subr.bf16.mxu0 %v4470_v21  ;;  %v4521_v21 = vld [vmem:[#allocation7 + $0x164] ss:$8 sps:$4 sm:$0xff]  }
 0x258   : > { %2670 = vmatpush1.bf16.msra.mxu1 %v4459_v22  ;;  %v4516_v22 = vld [vmem:[#allocation7 + $0x60] ss:$8 sps:$4 sm:$0xff]  }
 0x259   : > { %2671 = vmatprep.subr.bf16.mxu1 %v4467_v27  ;;  %2633 = vmatpush2.bf16.msra.mxu0 %v4468_v29  ;;  %v4519_v27 = vld [vmem:[#allocation7 + $0x160] ss:$8 sps:$4 sm:$0xff]   ;;  %v4524_v29 = vld [vmem:[#allocation7 + $0x54] ss:$8 sps:$4 sm:$0xff]  }
 0x25a   : > { %2634 = vmatprep.subr.bf16.mxu0 %v4476_v31  ;;  %v4527_v31 = vld [vmem:[#allocation7 + $0x154] ss:$8 sps:$4 sm:$0xff]  }
 0x25c   : > { %2672 = vmatpush2.bf16.msra.mxu1 %v4465_v34  ;;  %v4522_v34 = vld [vmem:[#allocation7 + $0x50] ss:$8 sps:$4 sm:$0xff]  }
 0x25d   : > { %2673 = vmatprep.subr.bf16.mxu1 %v4473_v35  ;;  %2635 = vmatpush2.bf16.msra.mxu0 %v4474_v37  ;;  %v4525_v35 = vld [vmem:[#allocation7 + $0x150] ss:$8 sps:$4 sm:$0xff]   ;;  %v4530_v37 = vld [vmem:[#allocation7 + $0x44] ss:$8 sps:$4 sm:$0xff]  }
 0x25e   : > { %2636 = vmatprep.subr.bf16.mxu0 %v4482_v38  ;;  %v4533_v38 = vld [vmem:[#allocation7 + $0x144] ss:$8 sps:$4 sm:$0xff]  }
 0x260   : > { %2674 = vmatpush2.bf16.msra.mxu1 %v4471_v39  ;;  %v4528_v39 = vld [vmem:[#allocation7 + $0x40] ss:$8 sps:$4 sm:$0xff]  }
 0x261   : > { %2675 = vmatprep.subr.bf16.mxu1 %v4479_v40  ;;  %2637 = vmatpush2.bf16.msra.mxu0 %v4480_v41  ;;  %v4531_v40 = vld [vmem:[#allocation7 + $0x140] ss:$8 sps:$4 sm:$0xff]   ;;  %v4536_v41 = vld [vmem:[#allocation7 + $0x34] ss:$8 sps:$4 sm:$0xff]  }
 0x262   : > { %2638 = vmatprep.subr.bf16.mxu0 %v4488_v45  ;;  %v4542_v45 = vld [vmem:[#allocation7 + $0x24] ss:$8 sps:$4 sm:$0xff]  }
 0x264   : > { %2676 = vmatpush2.bf16.msra.mxu1 %v4477_v42  ;;  %v4539_v42 = vld [vmem:[#allocation7 + $0x134] ss:$8 sps:$4 sm:$0xff]  }
 0x265   : > { %2677 = vmatprep.subr.bf16.mxu1 %v4485_v43  ;;  %2639 = vmatpush2.bf16.msra.mxu0 %v4486_v47  ;;  %v4534_v43 = vld [vmem:[#allocation7 + $0x30] ss:$8 sps:$4 sm:$0xff]   ;;  %v4540_v47 = vld [vmem:[#allocation7 + $0x20] ss:$8 sps:$4 sm:$0xff]  }
 0x266   : > { %2640 = vmatprep.subr.bf16.mxu0 %v4494_v49  ;;  %v4548_v49 = vld [vmem:[#allocation7 + $0x14] ss:$8 sps:$4 sm:$0xff]  }
 0x268   : > { %2678 = vmatpush2.bf16.msra.mxu1 %v4483_v44  ;;  %v4537_v44 = vld [vmem:[#allocation7 + $0x130] ss:$8 sps:$4 sm:$0xff]  }
 0x269   : > { %2679 = vmatprep.subr.bf16.mxu1 %v4491_v46  ;;  %2641 = vmatpush2.bf16.msra.mxu0 %v4492_v51  ;;  %v4545_v46 = vld [vmem:[#allocation7 + $0x124] ss:$8 sps:$4 sm:$0xff]   ;;  %v4546_v51 = vld [vmem:[#allocation7 + $0x10] ss:$8 sps:$4 sm:$0xff]  }
 0x26a   : > { %2642 = vmatprep.subr.bf16.mxu0 %v4500_v53  ;;  %v4554_v53 = vld [vmem:[#allocation7 + $0x4] ss:$8 sps:$4 sm:$0xff]  }
 0x26c   : > { %2680 = vmatpush2.bf16.msra.mxu1 %v4489_v48  ;;  %v4543_v48 = vld [vmem:[#allocation7 + $0x120] ss:$8 sps:$4 sm:$0xff]  }
 0x26d   : > { %2681 = vmatprep.subr.bf16.mxu1 %v4497_v50  ;;  %2643 = vmatpush2.bf16.msra.mxu0 %v4498_v55  ;;  %v4551_v50 = vld [vmem:[#allocation7 + $0x114] ss:$8 sps:$4 sm:$0xff]   ;;  %v4552_v55 = vld [vmem:[#allocation7] ss:$8 sps:$4 sm:$0xff]  }
 0x26e   : > { %2644 = vmatprep.subr.bf16.mxu0 %v4506_v57  ;;  %v4560_v57 = vld [vmem:[#allocation7 + $0xf4] ss:$8 sps:$4 sm:$0xff]  }
 0x270   : > { %2682 = vmatpush2.bf16.msra.mxu1 %v4495_v52  ;;  %v4549_v52 = vld [vmem:[#allocation7 + $0x110] ss:$8 sps:$4 sm:$0xff]  }
 0x271   : > { %2683 = vmatprep.subr.bf16.mxu1 %v4503_v54  ;;  %2645 = vmatpush2.bf16.msra.mxu0 %v4504_v58  ;;  %v4557_v54 = vld [vmem:[#allocation7 + $0x104] ss:$8 sps:$4 sm:$0xff]   ;;  %v4558_v58 = vld [vmem:[#allocation7 + $0xf0] ss:$8 sps:$4 sm:$0xff]  }
 0x272   : > { %3130 = vmatprep.subr.bf16.mxu0 %v4512_v60  ;;  %v4566_v60 = vld [vmem:[#allocation7 + $0xe4] ss:$8 sps:$4 sm:$0xff]  }
 0x274   : > { %2684 = vmatpush2.bf16.msra.mxu1 %v4501_v56  ;;  %v4555_v56 = vld [vmem:[#allocation7 + $0x100] ss:$8 sps:$4 sm:$0xff]  }
 0x275   : > { %2685 = vmatprep.subr.bf16.mxu1 %v4509_v30  ;;  %v4563_v30 = vld [vmem:[#allocation7 + $0x1f4] ss:$8 sps:$4 sm:$0xff]  }
 0x278   : > { %2686 = vmatpush2.bf16.msra.mxu1 %v4507_v59  ;;  %v4561_v59 = vld [vmem:[#allocation7 + $0x1f0] ss:$8 sps:$4 sm:$0xff]  }
 0x279   : > { %3171 = vmatprep.subr.bf16.mxu1 %v4515_v61  ;;  %v4569_v61 = vld [vmem:[#allocation7 + $0x1e4] ss:$8 sps:$4 sm:$0xff]  }
 0x2f3   : > { %v2097_v62 = vpop.f32.mrf.mxu1  ;;  %v2138_v36 = vpop.f32.mrf.mxu0 }
 0x2f4   : > { %v4990_v1 = vadd.f32 %v2097_v62, %v4973_v23  ;;  %v4993_v63 = vadd.f32 %v2138_v36, %v4975_v24  ;;  %v2158_v23 = vrot.slane %v2153_v3, %v4948_v26  ;;  %v2162_v24 = vrot.slane %v2153_v3, %v4954_v28  ;;  %v4564_v62 = vld [vmem:[#allocation7 + $0xe0] ss:$8 sps:$4 sm:$0xff]   ;;  %v4570_v3 = vld [vmem:[#allocation7 + $0xd0] ss:$8 sps:$4 sm:$0xff]  }
 0x2f5   : > { %v2099_v0 = vpop.f32.mrf.mxu1  ;;  %v2140_v2 = vpop.f32.mrf.mxu0  ;;  %v4567_v36 = vld [vmem:[#allocation7 + $0x1e0] ss:$8 sps:$4 sm:$0xff]  }
 0x2f6   : > { %v4999_v4 = vadd.f32 %v2099_v0, %v4980_v32  ;;  %v5002_v5 = vadd.f32 %v2140_v2, %v4982_v33  ;;  %v4513_v33 = vld [vmem:[#allocation7 + $0x170] ss:$8 sps:$4 sm:$0xff]   ;;  %v4572_v0 = vld [vmem:[#allocation7 + $0xd4] ss:$8 sps:$4 sm:$0xff]  }
 0x2f7   : > { %v2101_v6 = vpop.f32.mrf.mxu1  ;;  %v2142_v20 = vpop.f32.mrf.mxu0  ;;  %v4575_v2 = vld [vmem:[#allocation7 + $0x1d4] ss:$8 sps:$4 sm:$0xff]  }
 0x2f8   : > { %v4573_v6 = vld [vmem:[#allocation7 + $0x1d0] ss:$8 sps:$4 sm:$0xff]   ;;  %v4578_v20 = vld [vmem:[#allocation7 + $0xc4] ss:$8 sps:$4 sm:$0xff]  }
 0x2f9   : > { %v2102_v7 = vpop.f32.mrf.mxu1  ;;  %v2143_v8 = vpop.f32.mrf.mxu0 }
 0x2fa   : > { %v4576_v7 = vld [vmem:[#allocation7 + $0xc0] ss:$8 sps:$4 sm:$0xff]  }
 0x2fb   : > { %v2219_v9 = vpop.f32.mrf.mxu1  ;;  %v4579_v8 = vld [vmem:[#allocation7 + $0x1c0] ss:$8 sps:$4 sm:$0xff]  }
 0x2fc   : > { %v2220_v10 = vadd.f32 %v2219_v9, %v2158_v23  ;;  %v4581_v23 = vld [vmem:[#allocation7 + $0x1c4] ss:$8 sps:$4 sm:$0xff]   ;;  %v4587_v9 = vld [vmem:[#allocation7 + $0x1b4] ss:$8 sps:$4 sm:$0xff]  }
 0x2fd   : > { %v2221_v11 = vpop.f32.mrf.mxu1 }
 0x2fe   : > { %v2222_v12 = vadd.f32 %v2221_v11, %v2162_v24  ;;  %v2226_v13 = vmax.f32 %v2220_v10, 0.0  ;;  %v4584_v24 = vld [vmem:[#allocation7 + $0xb4] ss:$8 sps:$4 sm:$0xff]   ;;  %v4582_v10 = vld [vmem:[#allocation7 + $0xb0] ss:$8 sps:$4 sm:$0xff]  }
 0x2ff   : > { %v2223_v14 = vpop.f32.mrf.mxu1  ;;  %v4585_v11 = vld [vmem:[#allocation7 + $0x1b0] ss:$8 sps:$4 sm:$0xff]  }
 0x300   : > { %v2227_v15 = vmax.f32 %v2222_v12, 0.0  ;;  %v2228_v18 = vpack.c.bf16 %v2226_v13, %v2226_v13  ;;  %v4590_v12 = vld [vmem:[#allocation7 + $0xa4] ss:$8 sps:$4 sm:$0xff]   ;;  %v4588_v14 = vld [vmem:[#allocation7 + $0xa0] ss:$8 sps:$4 sm:$0xff]  }
 0x301   : > { %v2224_v32 = vpop.f32.mrf.mxu1  ;;  %v4593_v13 = vld [vmem:[#allocation7 + $0x1a4] ss:$8 sps:$4 sm:$0xff]  }
 0x302   : > { %v2229_v16 = vpack.c.bf16 %v2227_v15, %v2227_v15  ;;  %v4591_v15 = vld [vmem:[#allocation7 + $0x1a0] ss:$8 sps:$4 sm:$0xff]   ;;  %v4596_v32 = vld [vmem:[#allocation7 + $0x94] ss:$8 sps:$4 sm:$0xff]  }
 0x304   : > { %2646 = vmatprep.mubr.bf16.mxu0 %v2229_v16  ;;  %2687 = vmatprep.mubr.bf16.mxu1 %v2229_v16  ;;  %v4599_v16 = vld [vmem:[#allocation7 + $0x194] ss:$8 sps:$4 sm:$0xff]  }
 0x305   : > { %2647 = vmatmul.mubr.bf16.vlgmr.msra.gmra.mxu0 %v2228_v18  ;;  %2688 = vmatmul.mubr.bf16.vlgmr.msra.gmra.mxu1 %v2228_v18  ;;  %v4602_v18 = vld [vmem:[#allocation7 + $0x84] ss:$8 sps:$4 sm:$0xff]  }
 0x306   : > { %3131 = vmatpush1.bf16.msra.mxu0 %v4510_v17  ;;  %3172 = vmatpush1.bf16.msra.mxu1 %v4513_v33  ;;  %v4594_v17 = vld [vmem:[#allocation7 + $0x90] ss:$8 sps:$4 sm:$0xff]  }
 0x307   : > { %3132 = vmatprep.subr.bf16.mxu0 %v4518_v19  ;;  %3173 = vmatprep.subr.bf16.mxu1 %v4521_v21  ;;  %v4597_v33 = vld [vmem:[#allocation7 + $0x190] ss:$8 sps:$4 sm:$0xff]   ;;  %v4605_v19 = vld [vmem:[#allocation7 + $0x184] ss:$8 sps:$4 sm:$0xff]   ;;  %v4600_v21 = vld [vmem:[#allocation7 + $0x80] ss:$8 sps:$4 sm:$0xff]  }
 0x30a   : > { %3133 = vmatpush1.bf16.msra.mxu0 %v4516_v22  ;;  %3174 = vmatpush1.bf16.msra.mxu1 %v4519_v27  ;;  %v4603_v22 = vld [vmem:[#allocation7 + $0x180] ss:$8 sps:$4 sm:$0xff]   ;;  %v4606_v27 = vld [vmem:[#allocation8 + $0x78] sm:$0xff]  }
 0x30b   : > { %3134 = vmatprep.subr.bf16.mxu0 %v4524_v29  ;;  %3175 = vmatprep.subr.bf16.mxu1 %v4527_v31  ;;  %v2712_v29 = vsub.s32 2, %v4945_v25  ;;  %v2700_v31 = vld [vmem:[%s5067_s4] sm:$0xf] }
 0x30e   : > { %3135 = vmatpush1.bf16.msra.mxu0 %v4522_v34  ;;  %3176 = vmatpush1.bf16.msra.mxu1 %v4525_v35  ;;  %v2716_v34 = vsub.s32 3, %v4945_v25  ;;  %v2705_v35 = vrot.slane %v2700_v31, %v4948_v26 }
 0x30f   : > { %3136 = vmatprep.subr.bf16.mxu0 %v4530_v37  ;;  %3177 = vmatprep.subr.bf16.mxu1 %v4533_v38  ;;  %v2713_v37 = vrot.slane %v2700_v31, %v2712_v29 }
 0x312   : > { %3137 = vmatpush1.bf16.msra.mxu0 %v4528_v39  ;;  %3178 = vmatpush1.bf16.msra.mxu1 %v4531_v40 }
 0x313   : > { %3138 = vmatprep.subr.bf16.mxu0 %v4536_v41  ;;  %3179 = vmatprep.subr.bf16.mxu1 %v4539_v42  ;;  %v2709_v42 = vrot.slane %v2700_v31, %v4954_v28 }
 0x316   : > { %3139 = vmatpush1.bf16.msra.mxu0 %v4534_v43  ;;  %3180 = vmatpush1.bf16.msra.mxu1 %v4537_v44  ;;  %v2717_v43 = vrot.slane %v2700_v31, %v2716_v34 }
 0x317   : > { %3140 = vmatprep.subr.bf16.mxu0 %v4542_v45  ;;  %3181 = vmatprep.subr.bf16.mxu1 %v4545_v46 }
 0x31a   : > { %3141 = vmatpush1.bf16.msra.mxu0 %v4540_v47  ;;  %3182 = vmatpush1.bf16.msra.mxu1 %v4543_v48 }
 0x31b   : > { %3142 = vmatprep.subr.bf16.mxu0 %v4548_v49  ;;  %3183 = vmatprep.subr.bf16.mxu1 %v4551_v50 }
 0x31e   : > { %3143 = vmatpush1.bf16.msra.mxu0 %v4546_v51  ;;  %3184 = vmatpush1.bf16.msra.mxu1 %v4549_v52 }
 0x31f   : > { %3144 = vmatprep.subr.bf16.mxu0 %v4554_v53  ;;  %3185 = vmatprep.subr.bf16.mxu1 %v4557_v54 }
 0x322   : > { %3145 = vmatpush1.bf16.msra.mxu0 %v4552_v55  ;;  %3186 = vmatpush1.bf16.msra.mxu1 %v4555_v56 }
 0x323   : > { %3146 = vmatprep.subr.bf16.mxu0 %v4560_v57  ;;  %3187 = vmatprep.subr.bf16.mxu1 %v4563_v30 }
 0x326   : > { %3147 = vmatpush2.bf16.msra.mxu0 %v4558_v58  ;;  %3188 = vmatpush2.bf16.msra.mxu1 %v4561_v59  ;;  %v4607_v58 = vld [vmem:[#allocation8 + $0x38] sm:$0xff]  }
 0x327   : > { %3148 = vmatprep.subr.bf16.mxu0 %v4566_v60  ;;  %3189 = vmatprep.subr.bf16.mxu1 %v4569_v61  ;;  %v4608_v61 = vld [vmem:[#allocation8 + $0x70] sm:$0xff]  }
 0x32a   : > { %3149 = vmatpush2.bf16.msra.mxu0 %v4564_v62  ;;  %3190 = vmatpush2.bf16.msra.mxu1 %v4567_v36  ;;  %v4611_v62 = vld [vmem:[#allocation8 + $0x28] sm:$0xff]   ;;  %v4612_v36 = vld [vmem:[#allocation8 + $0x60] sm:$0xff]  }
 0x32b   : > { %3150 = vmatprep.subr.bf16.mxu0 %v4572_v0  ;;  %3191 = vmatprep.subr.bf16.mxu1 %v4575_v2  ;;  %v4613_v0 = vld [vmem:[#allocation8 + $0x20] sm:$0xff]   ;;  %v4614_v2 = vld [vmem:[#allocation8 + $0x58] sm:$0xff]  }
 0x32e   : > { %3151 = vmatpush2.bf16.msra.mxu0 %v4570_v3  ;;  %3192 = vmatpush2.bf16.msra.mxu1 %v4573_v6  ;;  %v4615_v3 = vld [vmem:[#allocation8 + $0x18] sm:$0xff]   ;;  %v4616_v6 = vld [vmem:[#allocation8 + $0x50] sm:$0xff]  }
 0x32f   : > { %3152 = vmatprep.subr.bf16.mxu0 %v4578_v20  ;;  %3193 = vmatprep.subr.bf16.mxu1 %v4581_v23  ;;  %v4617_v20 = vld [vmem:[#allocation8 + $0x10] sm:$0xff]   ;;  %v4618_v23 = vld [vmem:[#allocation8 + $0x48] sm:$0xff]  }
 0x332   : > { %3153 = vmatpush2.bf16.msra.mxu0 %v4576_v7  ;;  %3194 = vmatpush2.bf16.msra.mxu1 %v4579_v8  ;;  %v4619_v7 = vld [vmem:[#allocation8 + $0x8] sm:$0xff]   ;;  %v4620_v8 = vld [vmem:[#allocation8 + $0x40] sm:$0xff]  }
 0x333   : > { %3154 = vmatprep.subr.bf16.mxu0 %v4584_v24  ;;  %3195 = vmatprep.subr.bf16.mxu1 %v4587_v9  ;;  %v4621_v24 = vld [vmem:[#allocation8] sm:$0xff]   ;;  %v4622_v9 = vld [vmem:[%s5072_s9 + $0x38] sm:$0xff]  }
 0x336   : > { %3155 = vmatpush2.bf16.msra.mxu0 %v4582_v10  ;;  %3196 = vmatpush2.bf16.msra.mxu1 %v4585_v11  ;;  %v4771_v10 = vmov 0.0   ;;  %v4623_v11 = vld [vmem:[%s5072_s9 + $0x30] sm:$0xff]  }
 0x337   : > { %3156 = vmatprep.subr.bf16.mxu0 %v4590_v12  ;;  %3197 = vmatprep.subr.bf16.mxu1 %v4593_v13  ;;  %v4624_v12 = vld [vmem:[%s5072_s9 + $0x28] sm:$0xff]   ;;  %v4625_v13 = vld [vmem:[%s5072_s9 + $0x20] sm:$0xff]  }
 0x33a   : > { %3157 = vmatpush2.bf16.msra.mxu0 %v4588_v14  ;;  %3198 = vmatpush2.bf16.msra.mxu1 %v4591_v15  ;;  %v4626_v14 = vld [vmem:[%s5072_s9 + $0x18] sm:$0xff]   ;;  %v2798_v15 = vld [vmem:[%s5069_s6] sm:$0x3] }
 0x33b   : > { %3158 = vmatprep.subr.bf16.mxu0 %v4596_v32  ;;  %3199 = vmatprep.subr.bf16.mxu1 %v4599_v16  ;;  %v2803_v32 = vrot.slane %v2798_v15, %v4948_v26  ;;  %v2807_v16 = vrot.slane %v2798_v15, %v4954_v28  ;;  %v4627_v26 = vld [vmem:[%s5072_s9 + $0x10] sm:$0xff]   ;;  %v4628_v28 = vld [vmem:[%s5072_s9 + $0x8] sm:$0xff]  }
 0x33e   : > { %3159 = vmatpush2.bf16.msra.mxu0 %v4594_v17  ;;  %3200 = vmatpush2.bf16.msra.mxu1 %v4597_v33 }
 0x33f   : > { %3160 = vmatprep.subr.bf16.mxu0 %v4602_v18  ;;  %3201 = vmatprep.subr.bf16.mxu1 %v4605_v19 }
 0x342   : > { %3161 = vmatpush2.bf16.msra.mxu0 %v4600_v21  ;;  %3202 = vmatpush2.bf16.msra.mxu1 %v4603_v22 }
 0x343   : > { %4015 = vmatprep.subr.bf16.mxu0 %v4606_v27  ;;  %4046 = vmatprep.subr.bf16.mxu1 %v4771_v10 }
 0x3c5   : > { %v2648_v38 = vpop.f32.mrf.mxu0  ;;  %v2689_v39 = vpop.f32.mrf.mxu1 }
 0x3c6   : > { %v2696_v40 = vadd.f32 %v2648_v38, %v4990_v1  ;;  %v2698_v41 = vadd.f32 %v2689_v39, %v4993_v63 }
 0x3c7   : > { %v2650_v44 = vpop.f32.mrf.mxu0  ;;  %v2691_v45 = vpop.f32.mrf.mxu1 }
 0x3c8   : > { %v2722_v46 = vadd.f32 %v2705_v35, %v2696_v40  ;;  %v2724_v47 = vadd.f32 %v2713_v37, %v2698_v41  ;;  %v2697_v48 = vadd.f32 %v2650_v44, %v4999_v4  ;;  %v2699_v25 = vadd.f32 %v2691_v45, %v5002_v5  ;;  %v4609_v4 = vld [vmem:[#allocation8 + $0x30] sm:$0xff]   ;;  %v4610_v5 = vld [vmem:[#allocation8 + $0x68] sm:$0xff]   ;;  %v3984_v44 = vld [vmem:[%s5071_s8] ss:$0 sm:$0xff] }
 0x3c9   : > { %v2652_v49 = vpop.f32.mrf.mxu0  ;;  %v2693_v50 = vpop.f32.mrf.mxu1 }
 0x3ca   : > { %v2723_v51 = vadd.f32 %v2709_v42, %v2697_v48  ;;  %v2725_v52 = vadd.f32 %v2717_v43, %v2699_v25  ;;  %v2726_v53 = vmax.f32 %v2722_v46, 0.0  ;;  %v2728_v54 = vmax.f32 %v2724_v47, 0.0  ;;  %v4629_v42 = vld [vmem:[%s5072_s9] sm:$0xff]  }
 0x3cb   : > { %v2653_v1 = vpop.f32.mrf.mxu0  ;;  %v2694_v55 = vpop.f32.mrf.mxu1 }
 0x3cc   : > { %v2727_v63 = vmax.f32 %v2723_v51, 0.0  ;;  %v2729_v56 = vmax.f32 %v2725_v52, 0.0  ;;  %v2730_v59 = vpack.c.bf16 %v2726_v53, %v2726_v53  ;;  %v2732_v60 = vpack.c.bf16 %v2728_v54, %v2728_v54  ;;  %v4001_v51 = vld [vmem:[%s5073_s10] ss:$0 sm:$0xff] }
 0x3ce   : > { %v2731_v57 = vpack.c.bf16 %v2727_v63, %v2727_v63  ;;  %v2733_v30 = vpack.c.bf16 %v2729_v56, %v2729_v56 }
 0x3d0   : > { %3162 = vmatprep.mubr.bf16.mxu0 %v2731_v57  ;;  %3203 = vmatprep.mubr.bf16.mxu1 %v2733_v30  ;;  %v4010_v57 = vld [vmem:[%s5074_s11] ss:$0 sm:$0xff] }
 0x3d1   : > { %3163 = vmatmul.mubr.bf16.vlgmr.msra.gmra.mxu0 %v2730_v59  ;;  %3204 = vmatmul.mubr.bf16.vlgmr.msra.gmra.mxu1 %v2732_v60  ;;  %v4011_v60 = vld [vmem:[#allocation2] ss:$0 sm:$0xff] }
 0x3d2   : > { %4016 = vmatpush3.bf16.msra.mxu0 %v4607_v58  ;;  %4047 = vmatpush3.bf16.msra.mxu1 %v4622_v9 }
 0x3d3   : > { %4017 = vmatprep.subr.bf16.mxu0 %v4608_v61  ;;  %4048 = vmatprep.subr.bf16.mxu1 %v4771_v10 }
 0x3d4   : > { %4062 = vmatprep.mubr.msk.bf16.mxu1 %vm4772_vm1, %v4771_v10 }
 0x3d6   : > { %4018 = vmatpush3.bf16.msra.mxu0 %v4609_v4  ;;  %4049 = vmatpush3.bf16.msra.mxu1 %v4623_v11 }
 0x3d7   : > { %4019 = vmatprep.subr.bf16.mxu0 %v4610_v5  ;;  %4050 = vmatprep.subr.bf16.mxu1 %v4771_v10 }
 0x3da   : > { %4020 = vmatpush3.bf16.msra.mxu0 %v4611_v62  ;;  %4051 = vmatpush3.bf16.msra.mxu1 %v4624_v12 }
 0x3db   : > { %4021 = vmatprep.subr.bf16.mxu0 %v4612_v36  ;;  %4052 = vmatprep.subr.bf16.mxu1 %v4771_v10 }
 0x3de   : > { %4022 = vmatpush3.bf16.msra.mxu0 %v4613_v0  ;;  %4053 = vmatpush3.bf16.msra.mxu1 %v4625_v13 }
 0x3df   : > { %4023 = vmatprep.subr.bf16.mxu0 %v4614_v2  ;;  %4054 = vmatprep.subr.bf16.mxu1 %v4771_v10 }
 0x3e2   : > { %4024 = vmatpush3.bf16.msra.mxu0 %v4615_v3  ;;  %4055 = vmatpush3.bf16.msra.mxu1 %v4626_v14 }
 0x3e3   : > { %4025 = vmatprep.subr.bf16.mxu0 %v4616_v6  ;;  %4056 = vmatprep.subr.bf16.mxu1 %v4771_v10 }
 0x3e6   : > { %4026 = vmatpush3.bf16.msra.mxu0 %v4617_v20  ;;  %4057 = vmatpush3.bf16.msra.mxu1 %v4627_v26 }
 0x3e7   : > { %4027 = vmatprep.subr.bf16.mxu0 %v4618_v23  ;;  %4058 = vmatprep.subr.bf16.mxu1 %v4771_v10 }
 0x3ea   : > { %4028 = vmatpush3.bf16.msra.mxu0 %v4619_v7  ;;  %4059 = vmatpush3.bf16.msra.mxu1 %v4628_v28 }
 0x3eb   : > { %4029 = vmatprep.subr.bf16.mxu0 %v4620_v8  ;;  %4060 = vmatprep.subr.bf16.mxu1 %v4771_v10 }
 0x3ee   : > { %4030 = vmatpush3.bf16.msra.mxu0 %v4621_v24  ;;  %4061 = vmatpush3.bf16.msra.mxu1 %v4629_v42 }
 0x491   : > { %v3164_v17 = vpop.f32.mrf.mxu0  ;;  %v3205_v33 = vpop.f32.mrf.mxu1 }
 0x492   : > { %v3165_v18 = vadd.f32 %v3164_v17, %v2803_v32 }
 0x493   : > { %v3166_v19 = vpop.f32.mrf.mxu0  ;;  %v3207_v21 = vpop.f32.mrf.mxu1 }
 0x494   : > { %v3206_v22 = vadd.f32 %v3205_v33, %v3165_v18  ;;  %v3167_v27 = vadd.f32 %v3166_v19, %v2807_v16 }
 0x495   : > { %v3168_v29 = vpop.f32.mrf.mxu0  ;;  %v3209_v31 = vpop.f32.mrf.mxu1 }
 0x496   : > { %v3208_v34 = vadd.f32 %v3207_v21, %v3167_v27  ;;  %v3212_v35 = vmax.f32 %v3206_v22, 0.0 }
 0x497   : > { %v3169_v37 = vpop.f32.mrf.mxu0  ;;  %v3210_v38 = vpop.f32.mrf.mxu1 }
 0x498   : > { %v3213_v39 = vmax.f32 %v3208_v34, 0.0  ;;  %v3214_v41 = vpack.c.bf16 %v3212_v35, %v3212_v35 }
 0x49a   : > { %v3215_v40 = vpack.c.bf16 %v3213_v39, %v3213_v39 }
 0x49c   : > { %3383 = vmatprep.mubr.bf16.mxu0 %v3215_v40 }
 0x49d   : > { %3384 = vmatmul.mubr.bf16.vlgmr.msra.gmra.mxu0 %v3214_v41 }
 0x55d   : > { %v4031_v43 = vpop.f32.mrf.mxu0 }
 0x55f   : > { %v4032_v45 = vpop.f32.mrf.mxu0 }
 0x560   : > { %v4033_v46 = vadd.f32 %v4032_v45, %v4031_v43 }
 0x561   : > { %v4034_v47 = vpop.f32.mrf.mxu0 }
 0x562   : > { %v3386_v48 = vadd.f32 %v4033_v46, %v3984_v44 }
 0x563   : > { %v4035_v25 = vpop.f32.mrf.mxu0 }
 0x564   : > { %v3391_v49 = vmax.f32 %v3386_v48, 0.0 }
 0x566   : > { %v3392_v50 = vpack.c.bf16 %v3391_v49, %v3391_v49 }
 0x568   : > { %4063 = vmatmul.mubr.bf16.vlgmr.msra.gmra.mxu1 %v3392_v50 }
 0x628   : > { %v3498_v52 = vpop.f32.mrf.mxu1 }
 0x629   : > { %v3499_v53 = vadd.f32 %v4001_v51, %v3498_v52 }
 0x62a   : > { %v4064_v54 = vpop.f32.mrf.mxu1 }
 0x62b   : > { %v3504_v1 = vmax.f32 %v3499_v53, 0.0 }
 0x62c   : > { %v3501_v55 = vpop.f32.mrf.mxu1 }
 0x62d   : > { %v3505_v63 = vpack.c.bf16 %v3504_v1, %v3504_v1 }
 0x62e   : > { %v4065_v56 = vpop.f32.mrf.mxu1 }
 0x62f   : > { %v3506_v30 = vunpack.c.l.bf16 %v3505_v63 }
 0x631   : > { %v3514_v58 = vmul.f32 %v4010_v57, %v3506_v30 }
 0x633   : > { %v3516_v59 = vsel %vm3515_vm2, %v3514_v58, 0.0 }
 0x634   : > { %3517 = vadd.xlane.f32.xlu0 %v3516_v59 }
 0x6bd   : > { %v3518_v61 = vpop.xlane.xlu0 %3517 }
 0x6be   : > { %v3526_v4 = vadd.f32 %v4011_v60, %v3518_v61 }
 0x6c0   : > { %v4012_v5 = vmul.f32 -1.442695, %v3526_v4 }
 0x6c2   : > { %4630 = vpow2.f32 %v4012_v5 }
 0x6cf   : > { %v4631_v62 = vpop.eup %4630 }
 0x6d0   : > { %v3530_v36 = vadd.f32 1.0, %v4631_v62 }
 0x6d2   : > { %4632 = vrcp.f32 %v3530_v36 }
 0x6df   : > { %v4633_v0 = vpop.eup %4632 }
 0x6e0   : > { %3534 = vst.msk [vmem:[%s496_s22] sm:$0xff] %vm3533_vm3, %v4633_v0 }
 0x6e1 PF: > { %s28_s27 = sadd.s32 1, %s4756_s27  }
 0x6e2   : > { %p25_p2 = scmp.ge.s32.totalorder %s28_s27, 4  }
 0x6e4   :  { %27 = sbr.rel (!%p25_p2) target bundleno = 6 (0x6), region = 119 }
 0x6e9   :  { %3554 = vsyncpa [#allocation4], 1 }
 0x6ea   :  { %3556 = vsyncpa [#allocation4 + $0x1], 1 }
 0x6eb   :  { %3557 = vsyncpa [#allocation6], 1 }
 0x6ec   :  { %3558 = vsyncpa [#allocation9], 1 }

</bundles_post_ra>
